<compile_context>
chip_gen: v5e
topology: v5e:2x2
jax: 0.10.0
libtpu: 0.0.40
codegen_flags: <defaults>
</compile_context>

<pallas_src>
import functools

import jax
import jax.numpy as jnp
from jax.experimental import pallas as pl
from jax.experimental.pallas import tpu as pltpu


class Config:
    # small synthetic config consistent with the module's shape algebra
    k = 3
    maxseqlen = 18
    split = 2                       # must be 2: classifier input = 2*concat_features
    bert_hidden_size = 32
    bert_num_encoders = 1           # (unused by the simplified encoder stand-in)
    bert_num_attention_heads = 2    # (unused)
    bert_forward_size = 64          # (unused)
    skipgram_embed_size = 32
    skipgram_embed_dropout = 0.0
    covpredictor_hidden_size = 32
    covpredictor_num_lstm_layers = 1
    covpredictor_lstm_dropout = 0.0
    covpredictor_lstm_bidirectional = False
    covpredictor_pooler_dropout = 0.0
    linear_units = 32
    linear_dropout = 0.0

    bert_vocab_size = 4 ** k + 3            # 67
    bert_maxnum_token = maxseqlen - k + 2   # 17
    skipgram_vocab_size = 4 ** k + 1        # 65
    seqcomp_maxnum_token = maxseqlen - k + 1  # 16
    concat_features = bert_hidden_size + covpredictor_hidden_size  # 64


_VMEM = pltpu.MemorySpace.VMEM


# --------------------------------------------------------------------------- #
# Fused forward kernel.
#   inputs : sem_ids (2B, 2*17) i32, seq_ids (2B, 2*16) i32   [fw rows, rc rows]
#            w_enc (264, 128), b_enc (1, 128)   block-diagonal encoder weight
#            w1 (128, 32), b1/g/beta (1, 32), w2 (1, 32), b2 (1, 1)
#   output : probs (B, 1) = 0.5 * (sigmoid(head(fw)) + sigmoid(head(rc)))
# --------------------------------------------------------------------------- #
def _fused_forward_kernel(sem_ref, seq_ref, wenc_ref, benc_ref,
                          w1_ref, b1_ref, g_ref, beta_ref, w2_ref, b2_ref,
                          o_ref, p_ref, *, batch, vb, vs, tb, ts):
    rows = 2 * batch
    vtot = 2 * (vb + vs)
    vocab_iota = jax.lax.broadcasted_iota(jnp.int32, (1, vtot), 1)

    # Per-row token-count histogram over the packed vocab layout
    #   [bert split0 (vb) | skipgram split0 (vs) | bert split1 | skipgram split1].
    # Small static unrolled loop: only 2-D ops (masked loads, lane-broadcast
    # compare, add) -> trivially lowered, and the VPU cost is negligible.
    counts = jnp.zeros((rows, vtot), jnp.float32)
    for t in range(2 * tb):
        off = 0 if t < tb else (vb + vs)
        tok = sem_ref[:, pl.ds(t, 1)] + off                      # (rows, 1) i32
        counts = counts + jnp.where(tok == vocab_iota, 1.0, 0.0)
    for t in range(2 * ts):
        off = vb if t < ts else (2 * vb + vs)
        tok = seq_ref[:, pl.ds(t, 1)] + off
        counts = counts + jnp.where(tok == vocab_iota, 1.0, 0.0)

    # Encoder stand-in (mean-pool + dense + tanh), folded into a single
    # lane-dense MXU matmul against the block-diagonal weight (already scaled
    # by 1/T per block).  Produces the 128-wide classifier input directly.
    # TODO(synk): SemanticEncoder (BERT) / SeqcompositionEncoder (LSTM)
    # internals are not part of the provided module source; this reproduces
    # their (N, hidden) output shapes, not their exact internals.
    x = jnp.tanh(
        jnp.dot(counts, wenc_ref[...], preferred_element_type=jnp.float32)
        + benc_ref[...])                                         # (2B, 128)

    # Classifier head, run once over stacked fw/rc rows:
    # Linear -> LayerNorm -> ReLU -> (Dropout: identity) -> Linear -> Sigmoid.
    h = jnp.dot(x, w1_ref[...], preferred_element_type=jnp.float32) + b1_ref[...]
    mu = jnp.mean(h, axis=-1, keepdims=True)
    var = jnp.mean(jnp.square(h - mu), axis=-1, keepdims=True)
    hn = (h - mu) * jax.lax.rsqrt(var + 1e-5)
    hn = hn * g_ref[...] + beta_ref[...]
    hn = jnp.maximum(hn, 0.0)
    # TODO(synk): nn.Dropout treated as identity (inference mode).
    logits = jnp.sum(hn * w2_ref[...], axis=-1, keepdims=True) + b2_ref[...]
    probs = jax.nn.sigmoid(logits)                               # (2B, 1)

    # Average fw (rows 0:B) and rc (rows B:2B) via a tiny VMEM scratch so the
    # row split is a plain static ref slice.
    p_ref[...] = probs
    o_ref[...] = 0.5 * (p_ref[pl.ds(0, batch), :] + p_ref[pl.ds(batch, batch), :])


# --------------------------------------------------------------------------- #
# Weight prep (param-only, done once in the wrapper):
#   mean_t(emb[ids]) @ W + b  ==  counts @ (emb @ W / T) + b
# Four (vocab, hidden) blocks laid out block-diagonally so one matmul yields
# the lane-dense 128-wide concat feature [bert_s0 | sg_s0 | bert_s1 | sg_s1].
# --------------------------------------------------------------------------- #
def _pack_encoder_weights(params, cfg):
    vb, vs = cfg.bert_vocab_size, cfg.skipgram_vocab_size
    hb, hs = cfg.bert_hidden_size, cfg.covpredictor_hidden_size
    emb_wb = jnp.dot(params["bert_emb"], params["bert_w"]) / cfg.bert_maxnum_token
    emb_ws = jnp.dot(params["sg_emb"], params["sg_w"]) / cfg.seqcomp_maxnum_token
    vtot, ftot = 2 * (vb + vs), 2 * (hb + hs)
    w_enc = jnp.zeros((vtot, ftot), jnp.float32)
    w_enc = w_enc.at[0:vb, 0:hb].set(emb_wb)
    w_enc = w_enc.at[vb:vb + vs, hb:hb + hs].set(emb_ws)
    w_enc = w_enc.at[vb + vs:2 * vb + vs, hb + hs:2 * hb + hs].set(emb_wb)
    w_enc = w_enc.at[2 * vb + vs:vtot, 2 * hb + hs:ftot].set(emb_ws)
    b_enc = jnp.concatenate(
        [params["bert_b"], params["sg_b"], params["bert_b"], params["sg_b"]], axis=1)
    return w_enc, b_enc


# --------------------------------------------------------------------------- #
# Full forward, mirroring SeqCls_XL_Concat.forward (one pallas_call).
# --------------------------------------------------------------------------- #
def seqcls_xl_concat_forward(params, cfg, in_fw_sem, in_rc_sem, in_fw_seq, in_rc_seq):
    batch = in_fw_sem.shape[0]
    w_enc, b_enc = _pack_encoder_weights(params, cfg)

    # Stack fw over rc (rows 0:B = fw, B:2B = rc).  Split handling (columns)
    # is done in-kernel via static column offsets, so no other input glue.
    sem_ids = jnp.concatenate([in_fw_sem, in_rc_sem], axis=0).astype(jnp.int32)
    seq_ids = jnp.concatenate([in_fw_seq, in_rc_seq], axis=0).astype(jnp.int32)

    kernel = functools.partial(
        _fused_forward_kernel, batch=batch,
        vb=cfg.bert_vocab_size, vs=cfg.skipgram_vocab_size,
        tb=cfg.bert_maxnum_token, ts=cfg.seqcomp_maxnum_token)

    return pl.pallas_call(
        kernel,
        out_shape=jax.ShapeDtypeStruct((batch, 1), jnp.float32),
        in_specs=[pl.BlockSpec(memory_space=_VMEM)] * 10,
        out_specs=pl.BlockSpec(memory_space=_VMEM),
        scratch_shapes=[pltpu.VMEM((2 * batch, 1), jnp.float32)],
    )(sem_ids, seq_ids, w_enc, b_enc,
      params["cls_w1"], params["cls_b1"], params["ln_gamma"], params["ln_beta"],
      params["cls_w2"], params["cls_b2"])


# --------------------------------------------------------------------------- #
# Parameters (deterministic, synthetic).
# --------------------------------------------------------------------------- #
def init_params(cfg, key):
    ks = jax.random.split(key, 6)
    s = 0.02
    return dict(
        bert_emb=s * jax.random.normal(ks[0], (cfg.bert_vocab_size, cfg.bert_hidden_size), jnp.float32),
        bert_w=s * jax.random.normal(ks[1], (cfg.bert_hidden_size, cfg.bert_hidden_size), jnp.float32),
        bert_b=jnp.zeros((1, cfg.bert_hidden_size), jnp.float32),
        sg_emb=s * jax.random.normal(ks[2], (cfg.skipgram_vocab_size, cfg.skipgram_embed_size), jnp.float32),
        sg_w=s * jax.random.normal(ks[3], (cfg.skipgram_embed_size, cfg.covpredictor_hidden_size), jnp.float32),
        sg_b=jnp.zeros((1, cfg.covpredictor_hidden_size), jnp.float32),
        cls_w1=s * jax.random.normal(ks[4], (2 * cfg.concat_features, cfg.linear_units), jnp.float32),
        cls_b1=jnp.zeros((1, cfg.linear_units), jnp.float32),
        ln_gamma=jnp.ones((1, cfg.linear_units), jnp.float32),
        ln_beta=jnp.zeros((1, cfg.linear_units), jnp.float32),
        cls_w2=s * jax.random.normal(ks[5], (1, cfg.linear_units), jnp.float32),
        cls_b2=jnp.zeros((1, 1), jnp.float32),
    )


# --------------------------------------------------------------------------- #
# Pure-JAX reference of the same (stand-in) forward for validation.
# --------------------------------------------------------------------------- #
def _reference_forward(params, cfg, in_fw_sem, in_rc_sem, in_fw_seq, in_rc_seq):
    batch = in_fw_sem.shape[0]
    n = cfg.split * batch

    def encode(ids, emb, w, b, t):
        e = jnp.take(emb, ids.reshape(n, t), axis=0)             # (n, t, E)
        return jnp.tanh(jnp.mean(e, axis=1) @ w + b)

    def head(x):
        h = x @ params["cls_w1"] + params["cls_b1"]
        mu = jnp.mean(h, -1, keepdims=True)
        var = jnp.mean(jnp.square(h - mu), -1, keepdims=True)
        hn = (h - mu) * jax.lax.rsqrt(var + 1e-5)
        hn = jnp.maximum(hn * params["ln_gamma"] + params["ln_beta"], 0.0)
        return jax.nn.sigmoid(jnp.sum(hn * params["cls_w2"], -1, keepdims=True) + params["cls_b2"])

    def branch(sem, seqc):
        bert = encode(sem, params["bert_emb"], params["bert_w"], params["bert_b"], cfg.bert_maxnum_token)
        seqe = encode(seqc, params["sg_emb"], params["sg_w"], params["sg_b"], cfg.seqcomp_maxnum_token)
        return jnp.concatenate([bert, seqe], axis=1).reshape(batch, cfg.split * cfg.concat_features)

    return 0.5 * (head(branch(in_fw_sem, in_fw_seq)) + head(branch(in_rc_sem, in_rc_seq)))


if __name__ == "__main__":
    cfg = Config
    key = jax.random.PRNGKey(0)
    kp, k1, k2, k3, k4 = jax.random.split(key, 5)
    params = init_params(cfg, kp)

    batch = 2
    in_fw_sem = jax.random.randint(
        k1, (batch, cfg.split * cfg.bert_maxnum_token), 0, cfg.bert_vocab_size, jnp.int32)
    in_rc_sem = jax.random.randint(
        k2, (batch, cfg.split * cfg.bert_maxnum_token), 0, cfg.bert_vocab_size, jnp.int32)
    in_fw_seq = jax.random.randint(
        k3, (batch, cfg.split * cfg.seqcomp_maxnum_token), 0, cfg.skipgram_vocab_size, jnp.int32)
    in_rc_seq = jax.random.randint(
        k4, (batch, cfg.split * cfg.seqcomp_maxnum_token), 0, cfg.skipgram_vocab_size, jnp.int32)

    fwd = jax.jit(lambda a, b, c, d: seqcls_xl_concat_forward(params, cfg, a, b, c, d))
    probs = fwd(in_fw_sem, in_rc_sem, in_fw_seq, in_rc_seq)
    jax.block_until_ready(probs)

    assert probs.shape == (batch, 1)
    assert bool(jnp.all(jnp.isfinite(probs)))
    assert bool(jnp.all((probs >= 0.0) & (probs <= 1.0)))

    ref = _reference_forward(params, cfg, in_fw_sem, in_rc_sem, in_fw_seq, in_rc_seq)
    assert bool(jnp.all(jnp.abs(probs - ref) < 1e-2))

    print("KERNEL_OK")
</pallas_src>

<mosaic_0001>
module attributes {stable_mosaic.version = 11 : i64} {
  func.func @_fused_forward_kernel(%arg0: memref<4x34xi32, #tpu.memory_space<vmem>>, %arg1: memref<4x32xi32, #tpu.memory_space<vmem>>, %arg2: memref<264x128xf32, #tpu.memory_space<vmem>>, %arg3: memref<1x128xf32, #tpu.memory_space<vmem>>, %arg4: memref<128x32xf32, #tpu.memory_space<vmem>>, %arg5: memref<1x32xf32, #tpu.memory_space<vmem>>, %arg6: memref<1x32xf32, #tpu.memory_space<vmem>>, %arg7: memref<1x32xf32, #tpu.memory_space<vmem>>, %arg8: memref<1x32xf32, #tpu.memory_space<vmem>>, %arg9: memref<1x1xf32, #tpu.memory_space<vmem>>, %arg10: memref<2x1xf32, #tpu.memory_space<vmem>>, %arg11: memref<4x1xf32, #tpu.memory_space<vmem>>) attributes {dimension_semantics = [], scalar_prefetch = 0 : i64, scratch_operands = 1 : i64, tpu.core_type = #tpu.core_type<tc>} {
    %0 = tpu.iota {dimensions = array<i32: 1>} : vector<1x264xi32>
    %cst = arith.constant 0.000000e+00 : f32
    %1 = vector.broadcast %cst : f32 to vector<4x264xf32>
    %c0 = arith.constant 0 : index
    %c0_0 = arith.constant 0 : index
    %2 = vector.load %arg0[%c0, %c0_0] : memref<4x34xi32, #tpu.memory_space<vmem>>, vector<4x1xi32>
    %c0_i32 = arith.constant 0 : i32
    %3 = vector.broadcast %c0_i32 : i32 to vector<4x1xi32>
    %4 = arith.addi %2, %3 : vector<4x1xi32>
    %5 = vector.broadcast %4 : vector<4x1xi32> to vector<4x264xi32>
    %6 = vector.broadcast %0 : vector<1x264xi32> to vector<4x264xi32>
    %7 = arith.cmpi eq, %5, %6 : vector<4x264xi32>
    %cst_1 = arith.constant 1.000000e+00 : f32
    %cst_2 = arith.constant 0.000000e+00 : f32
    %8 = vector.broadcast %cst_1 : f32 to vector<4x264xf32>
    %9 = vector.broadcast %cst_2 : f32 to vector<4x264xf32>
    %10 = arith.select %7, %8, %9 : vector<4x264xi1>, vector<4x264xf32>
    %11 = arith.addf %1, %10 : vector<4x264xf32>
    %c0_3 = arith.constant 0 : index
    %c1 = arith.constant 1 : index
    %12 = vector.load %arg0[%c0_3, %c1] : memref<4x34xi32, #tpu.memory_space<vmem>>, vector<4x1xi32>
    %c0_i32_4 = arith.constant 0 : i32
    %13 = vector.broadcast %c0_i32_4 : i32 to vector<4x1xi32>
    %14 = arith.addi %12, %13 : vector<4x1xi32>
    %15 = vector.broadcast %14 : vector<4x1xi32> to vector<4x264xi32>
    %16 = vector.broadcast %0 : vector<1x264xi32> to vector<4x264xi32>
    %17 = arith.cmpi eq, %15, %16 : vector<4x264xi32>
    %cst_5 = arith.constant 1.000000e+00 : f32
    %cst_6 = arith.constant 0.000000e+00 : f32
    %18 = vector.broadcast %cst_5 : f32 to vector<4x264xf32>
    %19 = vector.broadcast %cst_6 : f32 to vector<4x264xf32>
    %20 = arith.select %17, %18, %19 : vector<4x264xi1>, vector<4x264xf32>
    %21 = arith.addf %11, %20 : vector<4x264xf32>
    %c0_7 = arith.constant 0 : index
    %c2 = arith.constant 2 : index
    %22 = vector.load %arg0[%c0_7, %c2] : memref<4x34xi32, #tpu.memory_space<vmem>>, vector<4x1xi32>
    %c0_i32_8 = arith.constant 0 : i32
    %23 = vector.broadcast %c0_i32_8 : i32 to vector<4x1xi32>
    %24 = arith.addi %22, %23 : vector<4x1xi32>
    %25 = vector.broadcast %24 : vector<4x1xi32> to vector<4x264xi32>
    %26 = vector.broadcast %0 : vector<1x264xi32> to vector<4x264xi32>
    %27 = arith.cmpi eq, %25, %26 : vector<4x264xi32>
    %cst_9 = arith.constant 1.000000e+00 : f32
    %cst_10 = arith.constant 0.000000e+00 : f32
    %28 = vector.broadcast %cst_9 : f32 to vector<4x264xf32>
    %29 = vector.broadcast %cst_10 : f32 to vector<4x264xf32>
    %30 = arith.select %27, %28, %29 : vector<4x264xi1>, vector<4x264xf32>
    %31 = arith.addf %21, %30 : vector<4x264xf32>
    %c0_11 = arith.constant 0 : index
    %c3 = arith.constant 3 : index
    %32 = vector.load %arg0[%c0_11, %c3] : memref<4x34xi32, #tpu.memory_space<vmem>>, vector<4x1xi32>
    %c0_i32_12 = arith.constant 0 : i32
    %33 = vector.broadcast %c0_i32_12 : i32 to vector<4x1xi32>
    %34 = arith.addi %32, %33 : vector<4x1xi32>
    %35 = vector.broadcast %34 : vector<4x1xi32> to vector<4x264xi32>
    %36 = vector.broadcast %0 : vector<1x264xi32> to vector<4x264xi32>
    %37 = arith.cmpi eq, %35, %36 : vector<4x264xi32>
    %cst_13 = arith.constant 1.000000e+00 : f32
    %cst_14 = arith.constant 0.000000e+00 : f32
    %38 = vector.broadcast %cst_13 : f32 to vector<4x264xf32>
    %39 = vector.broadcast %cst_14 : f32 to vector<4x264xf32>
    %40 = arith.select %37, %38, %39 : vector<4x264xi1>, vector<4x264xf32>
    %41 = arith.addf %31, %40 : vector<4x264xf32>
    %c0_15 = arith.constant 0 : index
    %c4 = arith.constant 4 : index
    %42 = vector.load %arg0[%c0_15, %c4] : memref<4x34xi32, #tpu.memory_space<vmem>>, vector<4x1xi32>
    %c0_i32_16 = arith.constant 0 : i32
    %43 = vector.broadcast %c0_i32_16 : i32 to vector<4x1xi32>
    %44 = arith.addi %42, %43 : vector<4x1xi32>
    %45 = vector.broadcast %44 : vector<4x1xi32> to vector<4x264xi32>
    %46 = vector.broadcast %0 : vector<1x264xi32> to vector<4x264xi32>
    %47 = arith.cmpi eq, %45, %46 : vector<4x264xi32>
    %cst_17 = arith.constant 1.000000e+00 : f32
    %cst_18 = arith.constant 0.000000e+00 : f32
    %48 = vector.broadcast %cst_17 : f32 to vector<4x264xf32>
    %49 = vector.broadcast %cst_18 : f32 to vector<4x264xf32>
    %50 = arith.select %47, %48, %49 : vector<4x264xi1>, vector<4x264xf32>
    %51 = arith.addf %41, %50 : vector<4x264xf32>
    %c0_19 = arith.constant 0 : index
    %c5 = arith.constant 5 : index
    %52 = vector.load %arg0[%c0_19, %c5] : memref<4x34xi32, #tpu.memory_space<vmem>>, vector<4x1xi32>
    %c0_i32_20 = arith.constant 0 : i32
    %53 = vector.broadcast %c0_i32_20 : i32 to vector<4x1xi32>
    %54 = arith.addi %52, %53 : vector<4x1xi32>
    %55 = vector.broadcast %54 : vector<4x1xi32> to vector<4x264xi32>
    %56 = vector.broadcast %0 : vector<1x264xi32> to vector<4x264xi32>
    %57 = arith.cmpi eq, %55, %56 : vector<4x264xi32>
    %cst_21 = arith.constant 1.000000e+00 : f32
    %cst_22 = arith.constant 0.000000e+00 : f32
    %58 = vector.broadcast %cst_21 : f32 to vector<4x264xf32>
    %59 = vector.broadcast %cst_22 : f32 to vector<4x264xf32>
    %60 = arith.select %57, %58, %59 : vector<4x264xi1>, vector<4x264xf32>
    %61 = arith.addf %51, %60 : vector<4x264xf32>
    %c0_23 = arith.constant 0 : index
    %c6 = arith.constant 6 : index
    %62 = vector.load %arg0[%c0_23, %c6] : memref<4x34xi32, #tpu.memory_space<vmem>>, vector<4x1xi32>
    %c0_i32_24 = arith.constant 0 : i32
    %63 = vector.broadcast %c0_i32_24 : i32 to vector<4x1xi32>
    %64 = arith.addi %62, %63 : vector<4x1xi32>
    %65 = vector.broadcast %64 : vector<4x1xi32> to vector<4x264xi32>
    %66 = vector.broadcast %0 : vector<1x264xi32> to vector<4x264xi32>
    %67 = arith.cmpi eq, %65, %66 : vector<4x264xi32>
    %cst_25 = arith.constant 1.000000e+00 : f32
    %cst_26 = arith.constant 0.000000e+00 : f32
    %68 = vector.broadcast %cst_25 : f32 to vector<4x264xf32>
    %69 = vector.broadcast %cst_26 : f32 to vector<4x264xf32>
    %70 = arith.select %67, %68, %69 : vector<4x264xi1>, vector<4x264xf32>
    %71 = arith.addf %61, %70 : vector<4x264xf32>
    %c0_27 = arith.constant 0 : index
    %c7 = arith.constant 7 : index
    %72 = vector.load %arg0[%c0_27, %c7] : memref<4x34xi32, #tpu.memory_space<vmem>>, vector<4x1xi32>
    %c0_i32_28 = arith.constant 0 : i32
    %73 = vector.broadcast %c0_i32_28 : i32 to vector<4x1xi32>
    %74 = arith.addi %72, %73 : vector<4x1xi32>
    %75 = vector.broadcast %74 : vector<4x1xi32> to vector<4x264xi32>
    %76 = vector.broadcast %0 : vector<1x264xi32> to vector<4x264xi32>
    %77 = arith.cmpi eq, %75, %76 : vector<4x264xi32>
    %cst_29 = arith.constant 1.000000e+00 : f32
    %cst_30 = arith.constant 0.000000e+00 : f32
    %78 = vector.broadcast %cst_29 : f32 to vector<4x264xf32>
    %79 = vector.broadcast %cst_30 : f32 to vector<4x264xf32>
    %80 = arith.select %77, %78, %79 : vector<4x264xi1>, vector<4x264xf32>
    %81 = arith.addf %71, %80 : vector<4x264xf32>
    %c0_31 = arith.constant 0 : index
    %c8 = arith.constant 8 : index
    %82 = vector.load %arg0[%c0_31, %c8] : memref<4x34xi32, #tpu.memory_space<vmem>>, vector<4x1xi32>
    %c0_i32_32 = arith.constant 0 : i32
    %83 = vector.broadcast %c0_i32_32 : i32 to vector<4x1xi32>
    %84 = arith.addi %82, %83 : vector<4x1xi32>
    %85 = vector.broadcast %84 : vector<4x1xi32> to vector<4x264xi32>
    %86 = vector.broadcast %0 : vector<1x264xi32> to vector<4x264xi32>
    %87 = arith.cmpi eq, %85, %86 : vector<4x264xi32>
    %cst_33 = arith.constant 1.000000e+00 : f32
    %cst_34 = arith.constant 0.000000e+00 : f32
    %88 = vector.broadcast %cst_33 : f32 to vector<4x264xf32>
    %89 = vector.broadcast %cst_34 : f32 to vector<4x264xf32>
    %90 = arith.select %87, %88, %89 : vector<4x264xi1>, vector<4x264xf32>
    %91 = arith.addf %81, %90 : vector<4x264xf32>
    %c0_35 = arith.constant 0 : index
    %c9 = arith.constant 9 : index
    %92 = vector.load %arg0[%c0_35, %c9] : memref<4x34xi32, #tpu.memory_space<vmem>>, vector<4x1xi32>
    %c0_i32_36 = arith.constant 0 : i32
    %93 = vector.broadcast %c0_i32_36 : i32 to vector<4x1xi32>
    %94 = arith.addi %92, %93 : vector<4x1xi32>
    %95 = vector.broadcast %94 : vector<4x1xi32> to vector<4x264xi32>
    %96 = vector.broadcast %0 : vector<1x264xi32> to vector<4x264xi32>
    %97 = arith.cmpi eq, %95, %96 : vector<4x264xi32>
    %cst_37 = arith.constant 1.000000e+00 : f32
    %cst_38 = arith.constant 0.000000e+00 : f32
    %98 = vector.broadcast %cst_37 : f32 to vector<4x264xf32>
    %99 = vector.broadcast %cst_38 : f32 to vector<4x264xf32>
    %100 = arith.select %97, %98, %99 : vector<4x264xi1>, vector<4x264xf32>
    %101 = arith.addf %91, %100 : vector<4x264xf32>
    %c0_39 = arith.constant 0 : index
    %c10 = arith.constant 10 : index
    %102 = vector.load %arg0[%c0_39, %c10] : memref<4x34xi32, #tpu.memory_space<vmem>>, vector<4x1xi32>
    %c0_i32_40 = arith.constant 0 : i32
    %103 = vector.broadcast %c0_i32_40 : i32 to vector<4x1xi32>
    %104 = arith.addi %102, %103 : vector<4x1xi32>
    %105 = vector.broadcast %104 : vector<4x1xi32> to vector<4x264xi32>
    %106 = vector.broadcast %0 : vector<1x264xi32> to vector<4x264xi32>
    %107 = arith.cmpi eq, %105, %106 : vector<4x264xi32>
    %cst_41 = arith.constant 1.000000e+00 : f32
    %cst_42 = arith.constant 0.000000e+00 : f32
    %108 = vector.broadcast %cst_41 : f32 to vector<4x264xf32>
    %109 = vector.broadcast %cst_42 : f32 to vector<4x264xf32>
    %110 = arith.select %107, %108, %109 : vector<4x264xi1>, vector<4x264xf32>
    %111 = arith.addf %101, %110 : vector<4x264xf32>
    %c0_43 = arith.constant 0 : index
    %c11 = arith.constant 11 : index
    %112 = vector.load %arg0[%c0_43, %c11] : memref<4x34xi32, #tpu.memory_space<vmem>>, vector<4x1xi32>
    %c0_i32_44 = arith.constant 0 : i32
    %113 = vector.broadcast %c0_i32_44 : i32 to vector<4x1xi32>
    %114 = arith.addi %112, %113 : vector<4x1xi32>
    %115 = vector.broadcast %114 : vector<4x1xi32> to vector<4x264xi32>
    %116 = vector.broadcast %0 : vector<1x264xi32> to vector<4x264xi32>
    %117 = arith.cmpi eq, %115, %116 : vector<4x264xi32>
    %cst_45 = arith.constant 1.000000e+00 : f32
    %cst_46 = arith.constant 0.000000e+00 : f32
    %118 = vector.broadcast %cst_45 : f32 to vector<4x264xf32>
    %119 = vector.broadcast %cst_46 : f32 to vector<4x264xf32>
    %120 = arith.select %117, %118, %119 : vector<4x264xi1>, vector<4x264xf32>
    %121 = arith.addf %111, %120 : vector<4x264xf32>
    %c0_47 = arith.constant 0 : index
    %c12 = arith.constant 12 : index
    %122 = vector.load %arg0[%c0_47, %c12] : memref<4x34xi32, #tpu.memory_space<vmem>>, vector<4x1xi32>
    %c0_i32_48 = arith.constant 0 : i32
    %123 = vector.broadcast %c0_i32_48 : i32 to vector<4x1xi32>
    %124 = arith.addi %122, %123 : vector<4x1xi32>
    %125 = vector.broadcast %124 : vector<4x1xi32> to vector<4x264xi32>
    %126 = vector.broadcast %0 : vector<1x264xi32> to vector<4x264xi32>
    %127 = arith.cmpi eq, %125, %126 : vector<4x264xi32>
    %cst_49 = arith.constant 1.000000e+00 : f32
    %cst_50 = arith.constant 0.000000e+00 : f32
    %128 = vector.broadcast %cst_49 : f32 to vector<4x264xf32>
    %129 = vector.broadcast %cst_50 : f32 to vector<4x264xf32>
    %130 = arith.select %127, %128, %129 : vector<4x264xi1>, vector<4x264xf32>
    %131 = arith.addf %121, %130 : vector<4x264xf32>
    %c0_51 = arith.constant 0 : index
    %c13 = arith.constant 13 : index
    %132 = vector.load %arg0[%c0_51, %c13] : memref<4x34xi32, #tpu.memory_space<vmem>>, vector<4x1xi32>
    %c0_i32_52 = arith.constant 0 : i32
    %133 = vector.broadcast %c0_i32_52 : i32 to vector<4x1xi32>
    %134 = arith.addi %132, %133 : vector<4x1xi32>
    %135 = vector.broadcast %134 : vector<4x1xi32> to vector<4x264xi32>
    %136 = vector.broadcast %0 : vector<1x264xi32> to vector<4x264xi32>
    %137 = arith.cmpi eq, %135, %136 : vector<4x264xi32>
    %cst_53 = arith.constant 1.000000e+00 : f32
    %cst_54 = arith.constant 0.000000e+00 : f32
    %138 = vector.broadcast %cst_53 : f32 to vector<4x264xf32>
    %139 = vector.broadcast %cst_54 : f32 to vector<4x264xf32>
    %140 = arith.select %137, %138, %139 : vector<4x264xi1>, vector<4x264xf32>
    %141 = arith.addf %131, %140 : vector<4x264xf32>
    %c0_55 = arith.constant 0 : index
    %c14 = arith.constant 14 : index
    %142 = vector.load %arg0[%c0_55, %c14] : memref<4x34xi32, #tpu.memory_space<vmem>>, vector<4x1xi32>
    %c0_i32_56 = arith.constant 0 : i32
    %143 = vector.broadcast %c0_i32_56 : i32 to vector<4x1xi32>
    %144 = arith.addi %142, %143 : vector<4x1xi32>
    %145 = vector.broadcast %144 : vector<4x1xi32> to vector<4x264xi32>
    %146 = vector.broadcast %0 : vector<1x264xi32> to vector<4x264xi32>
    %147 = arith.cmpi eq, %145, %146 : vector<4x264xi32>
    %cst_57 = arith.constant 1.000000e+00 : f32
    %cst_58 = arith.constant 0.000000e+00 : f32
    %148 = vector.broadcast %cst_57 : f32 to vector<4x264xf32>
    %149 = vector.broadcast %cst_58 : f32 to vector<4x264xf32>
    %150 = arith.select %147, %148, %149 : vector<4x264xi1>, vector<4x264xf32>
    %151 = arith.addf %141, %150 : vector<4x264xf32>
    %c0_59 = arith.constant 0 : index
    %c15 = arith.constant 15 : index
    %152 = vector.load %arg0[%c0_59, %c15] : memref<4x34xi32, #tpu.memory_space<vmem>>, vector<4x1xi32>
    %c0_i32_60 = arith.constant 0 : i32
    %153 = vector.broadcast %c0_i32_60 : i32 to vector<4x1xi32>
    %154 = arith.addi %152, %153 : vector<4x1xi32>
    %155 = vector.broadcast %154 : vector<4x1xi32> to vector<4x264xi32>
    %156 = vector.broadcast %0 : vector<1x264xi32> to vector<4x264xi32>
    %157 = arith.cmpi eq, %155, %156 : vector<4x264xi32>
    %cst_61 = arith.constant 1.000000e+00 : f32
    %cst_62 = arith.constant 0.000000e+00 : f32
    %158 = vector.broadcast %cst_61 : f32 to vector<4x264xf32>
    %159 = vector.broadcast %cst_62 : f32 to vector<4x264xf32>
    %160 = arith.select %157, %158, %159 : vector<4x264xi1>, vector<4x264xf32>
    %161 = arith.addf %151, %160 : vector<4x264xf32>
    %c0_63 = arith.constant 0 : index
    %c16 = arith.constant 16 : index
    %162 = vector.load %arg0[%c0_63, %c16] : memref<4x34xi32, #tpu.memory_space<vmem>>, vector<4x1xi32>
    %c0_i32_64 = arith.constant 0 : i32
    %163 = vector.broadcast %c0_i32_64 : i32 to vector<4x1xi32>
    %164 = arith.addi %162, %163 : vector<4x1xi32>
    %165 = vector.broadcast %164 : vector<4x1xi32> to vector<4x264xi32>
    %166 = vector.broadcast %0 : vector<1x264xi32> to vector<4x264xi32>
    %167 = arith.cmpi eq, %165, %166 : vector<4x264xi32>
    %cst_65 = arith.constant 1.000000e+00 : f32
    %cst_66 = arith.constant 0.000000e+00 : f32
    %168 = vector.broadcast %cst_65 : f32 to vector<4x264xf32>
    %169 = vector.broadcast %cst_66 : f32 to vector<4x264xf32>
    %170 = arith.select %167, %168, %169 : vector<4x264xi1>, vector<4x264xf32>
    %171 = arith.addf %161, %170 : vector<4x264xf32>
    %c0_67 = arith.constant 0 : index
    %c17 = arith.constant 17 : index
    %172 = vector.load %arg0[%c0_67, %c17] : memref<4x34xi32, #tpu.memory_space<vmem>>, vector<4x1xi32>
    %c132_i32 = arith.constant 132 : i32
    %173 = vector.broadcast %c132_i32 : i32 to vector<4x1xi32>
    %174 = arith.addi %172, %173 : vector<4x1xi32>
    %175 = vector.broadcast %174 : vector<4x1xi32> to vector<4x264xi32>
    %176 = vector.broadcast %0 : vector<1x264xi32> to vector<4x264xi32>
    %177 = arith.cmpi eq, %175, %176 : vector<4x264xi32>
    %cst_68 = arith.constant 1.000000e+00 : f32
    %cst_69 = arith.constant 0.000000e+00 : f32
    %178 = vector.broadcast %cst_68 : f32 to vector<4x264xf32>
    %179 = vector.broadcast %cst_69 : f32 to vector<4x264xf32>
    %180 = arith.select %177, %178, %179 : vector<4x264xi1>, vector<4x264xf32>
    %181 = arith.addf %171, %180 : vector<4x264xf32>
    %c0_70 = arith.constant 0 : index
    %c18 = arith.constant 18 : index
    %182 = vector.load %arg0[%c0_70, %c18] : memref<4x34xi32, #tpu.memory_space<vmem>>, vector<4x1xi32>
    %c132_i32_71 = arith.constant 132 : i32
    %183 = vector.broadcast %c132_i32_71 : i32 to vector<4x1xi32>
    %184 = arith.addi %182, %183 : vector<4x1xi32>
    %185 = vector.broadcast %184 : vector<4x1xi32> to vector<4x264xi32>
    %186 = vector.broadcast %0 : vector<1x264xi32> to vector<4x264xi32>
    %187 = arith.cmpi eq, %185, %186 : vector<4x264xi32>
    %cst_72 = arith.constant 1.000000e+00 : f32
    %cst_73 = arith.constant 0.000000e+00 : f32
    %188 = vector.broadcast %cst_72 : f32 to vector<4x264xf32>
    %189 = vector.broadcast %cst_73 : f32 to vector<4x264xf32>
    %190 = arith.select %187, %188, %189 : vector<4x264xi1>, vector<4x264xf32>
    %191 = arith.addf %181, %190 : vector<4x264xf32>
    %c0_74 = arith.constant 0 : index
    %c19 = arith.constant 19 : index
    %192 = vector.load %arg0[%c0_74, %c19] : memref<4x34xi32, #tpu.memory_space<vmem>>, vector<4x1xi32>
    %c132_i32_75 = arith.constant 132 : i32
    %193 = vector.broadcast %c132_i32_75 : i32 to vector<4x1xi32>
    %194 = arith.addi %192, %193 : vector<4x1xi32>
    %195 = vector.broadcast %194 : vector<4x1xi32> to vector<4x264xi32>
    %196 = vector.broadcast %0 : vector<1x264xi32> to vector<4x264xi32>
    %197 = arith.cmpi eq, %195, %196 : vector<4x264xi32>
    %cst_76 = arith.constant 1.000000e+00 : f32
    %cst_77 = arith.constant 0.000000e+00 : f32
    %198 = vector.broadcast %cst_76 : f32 to vector<4x264xf32>
    %199 = vector.broadcast %cst_77 : f32 to vector<4x264xf32>
    %200 = arith.select %197, %198, %199 : vector<4x264xi1>, vector<4x264xf32>
    %201 = arith.addf %191, %200 : vector<4x264xf32>
    %c0_78 = arith.constant 0 : index
    %c20 = arith.constant 20 : index
    %202 = vector.load %arg0[%c0_78, %c20] : memref<4x34xi32, #tpu.memory_space<vmem>>, vector<4x1xi32>
    %c132_i32_79 = arith.constant 132 : i32
    %203 = vector.broadcast %c132_i32_79 : i32 to vector<4x1xi32>
    %204 = arith.addi %202, %203 : vector<4x1xi32>
    %205 = vector.broadcast %204 : vector<4x1xi32> to vector<4x264xi32>
    %206 = vector.broadcast %0 : vector<1x264xi32> to vector<4x264xi32>
    %207 = arith.cmpi eq, %205, %206 : vector<4x264xi32>
    %cst_80 = arith.constant 1.000000e+00 : f32
    %cst_81 = arith.constant 0.000000e+00 : f32
    %208 = vector.broadcast %cst_80 : f32 to vector<4x264xf32>
    %209 = vector.broadcast %cst_81 : f32 to vector<4x264xf32>
    %210 = arith.select %207, %208, %209 : vector<4x264xi1>, vector<4x264xf32>
    %211 = arith.addf %201, %210 : vector<4x264xf32>
    %c0_82 = arith.constant 0 : index
    %c21 = arith.constant 21 : index
    %212 = vector.load %arg0[%c0_82, %c21] : memref<4x34xi32, #tpu.memory_space<vmem>>, vector<4x1xi32>
    %c132_i32_83 = arith.constant 132 : i32
    %213 = vector.broadcast %c132_i32_83 : i32 to vector<4x1xi32>
    %214 = arith.addi %212, %213 : vector<4x1xi32>
    %215 = vector.broadcast %214 : vector<4x1xi32> to vector<4x264xi32>
    %216 = vector.broadcast %0 : vector<1x264xi32> to vector<4x264xi32>
    %217 = arith.cmpi eq, %215, %216 : vector<4x264xi32>
    %cst_84 = arith.constant 1.000000e+00 : f32
    %cst_85 = arith.constant 0.000000e+00 : f32
    %218 = vector.broadcast %cst_84 : f32 to vector<4x264xf32>
    %219 = vector.broadcast %cst_85 : f32 to vector<4x264xf32>
    %220 = arith.select %217, %218, %219 : vector<4x264xi1>, vector<4x264xf32>
    %221 = arith.addf %211, %220 : vector<4x264xf32>
    %c0_86 = arith.constant 0 : index
    %c22 = arith.constant 22 : index
    %222 = vector.load %arg0[%c0_86, %c22] : memref<4x34xi32, #tpu.memory_space<vmem>>, vector<4x1xi32>
    %c132_i32_87 = arith.constant 132 : i32
    %223 = vector.broadcast %c132_i32_87 : i32 to vector<4x1xi32>
    %224 = arith.addi %222, %223 : vector<4x1xi32>
    %225 = vector.broadcast %224 : vector<4x1xi32> to vector<4x264xi32>
    %226 = vector.broadcast %0 : vector<1x264xi32> to vector<4x264xi32>
    %227 = arith.cmpi eq, %225, %226 : vector<4x264xi32>
    %cst_88 = arith.constant 1.000000e+00 : f32
    %cst_89 = arith.constant 0.000000e+00 : f32
    %228 = vector.broadcast %cst_88 : f32 to vector<4x264xf32>
    %229 = vector.broadcast %cst_89 : f32 to vector<4x264xf32>
    %230 = arith.select %227, %228, %229 : vector<4x264xi1>, vector<4x264xf32>
    %231 = arith.addf %221, %230 : vector<4x264xf32>
    %c0_90 = arith.constant 0 : index
    %c23 = arith.constant 23 : index
    %232 = vector.load %arg0[%c0_90, %c23] : memref<4x34xi32, #tpu.memory_space<vmem>>, vector<4x1xi32>
    %c132_i32_91 = arith.constant 132 : i32
    %233 = vector.broadcast %c132_i32_91 : i32 to vector<4x1xi32>
    %234 = arith.addi %232, %233 : vector<4x1xi32>
    %235 = vector.broadcast %234 : vector<4x1xi32> to vector<4x264xi32>
    %236 = vector.broadcast %0 : vector<1x264xi32> to vector<4x264xi32>
    %237 = arith.cmpi eq, %235, %236 : vector<4x264xi32>
    %cst_92 = arith.constant 1.000000e+00 : f32
    %cst_93 = arith.constant 0.000000e+00 : f32
    %238 = vector.broadcast %cst_92 : f32 to vector<4x264xf32>
    %239 = vector.broadcast %cst_93 : f32 to vector<4x264xf32>
    %240 = arith.select %237, %238, %239 : vector<4x264xi1>, vector<4x264xf32>
    %241 = arith.addf %231, %240 : vector<4x264xf32>
    %c0_94 = arith.constant 0 : index
    %c24 = arith.constant 24 : index
    %242 = vector.load %arg0[%c0_94, %c24] : memref<4x34xi32, #tpu.memory_space<vmem>>, vector<4x1xi32>
    %c132_i32_95 = arith.constant 132 : i32
    %243 = vector.broadcast %c132_i32_95 : i32 to vector<4x1xi32>
    %244 = arith.addi %242, %243 : vector<4x1xi32>
    %245 = vector.broadcast %244 : vector<4x1xi32> to vector<4x264xi32>
    %246 = vector.broadcast %0 : vector<1x264xi32> to vector<4x264xi32>
    %247 = arith.cmpi eq, %245, %246 : vector<4x264xi32>
    %cst_96 = arith.constant 1.000000e+00 : f32
    %cst_97 = arith.constant 0.000000e+00 : f32
    %248 = vector.broadcast %cst_96 : f32 to vector<4x264xf32>
    %249 = vector.broadcast %cst_97 : f32 to vector<4x264xf32>
    %250 = arith.select %247, %248, %249 : vector<4x264xi1>, vector<4x264xf32>
    %251 = arith.addf %241, %250 : vector<4x264xf32>
    %c0_98 = arith.constant 0 : index
    %c25 = arith.constant 25 : index
    %252 = vector.load %arg0[%c0_98, %c25] : memref<4x34xi32, #tpu.memory_space<vmem>>, vector<4x1xi32>
    %c132_i32_99 = arith.constant 132 : i32
    %253 = vector.broadcast %c132_i32_99 : i32 to vector<4x1xi32>
    %254 = arith.addi %252, %253 : vector<4x1xi32>
    %255 = vector.broadcast %254 : vector<4x1xi32> to vector<4x264xi32>
    %256 = vector.broadcast %0 : vector<1x264xi32> to vector<4x264xi32>
    %257 = arith.cmpi eq, %255, %256 : vector<4x264xi32>
    %cst_100 = arith.constant 1.000000e+00 : f32
    %cst_101 = arith.constant 0.000000e+00 : f32
    %258 = vector.broadcast %cst_100 : f32 to vector<4x264xf32>
    %259 = vector.broadcast %cst_101 : f32 to vector<4x264xf32>
    %260 = arith.select %257, %258, %259 : vector<4x264xi1>, vector<4x264xf32>
    %261 = arith.addf %251, %260 : vector<4x264xf32>
    %c0_102 = arith.constant 0 : index
    %c26 = arith.constant 26 : index
    %262 = vector.load %arg0[%c0_102, %c26] : memref<4x34xi32, #tpu.memory_space<vmem>>, vector<4x1xi32>
    %c132_i32_103 = arith.constant 132 : i32
    %263 = vector.broadcast %c132_i32_103 : i32 to vector<4x1xi32>
    %264 = arith.addi %262, %263 : vector<4x1xi32>
    %265 = vector.broadcast %264 : vector<4x1xi32> to vector<4x264xi32>
    %266 = vector.broadcast %0 : vector<1x264xi32> to vector<4x264xi32>
    %267 = arith.cmpi eq, %265, %266 : vector<4x264xi32>
    %cst_104 = arith.constant 1.000000e+00 : f32
    %cst_105 = arith.constant 0.000000e+00 : f32
    %268 = vector.broadcast %cst_104 : f32 to vector<4x264xf32>
    %269 = vector.broadcast %cst_105 : f32 to vector<4x264xf32>
    %270 = arith.select %267, %268, %269 : vector<4x264xi1>, vector<4x264xf32>
    %271 = arith.addf %261, %270 : vector<4x264xf32>
    %c0_106 = arith.constant 0 : index
    %c27 = arith.constant 27 : index
    %272 = vector.load %arg0[%c0_106, %c27] : memref<4x34xi32, #tpu.memory_space<vmem>>, vector<4x1xi32>
    %c132_i32_107 = arith.constant 132 : i32
    %273 = vector.broadcast %c132_i32_107 : i32 to vector<4x1xi32>
    %274 = arith.addi %272, %273 : vector<4x1xi32>
    %275 = vector.broadcast %274 : vector<4x1xi32> to vector<4x264xi32>
    %276 = vector.broadcast %0 : vector<1x264xi32> to vector<4x264xi32>
    %277 = arith.cmpi eq, %275, %276 : vector<4x264xi32>
    %cst_108 = arith.constant 1.000000e+00 : f32
    %cst_109 = arith.constant 0.000000e+00 : f32
    %278 = vector.broadcast %cst_108 : f32 to vector<4x264xf32>
    %279 = vector.broadcast %cst_109 : f32 to vector<4x264xf32>
    %280 = arith.select %277, %278, %279 : vector<4x264xi1>, vector<4x264xf32>
    %281 = arith.addf %271, %280 : vector<4x264xf32>
    %c0_110 = arith.constant 0 : index
    %c28 = arith.constant 28 : index
    %282 = vector.load %arg0[%c0_110, %c28] : memref<4x34xi32, #tpu.memory_space<vmem>>, vector<4x1xi32>
    %c132_i32_111 = arith.constant 132 : i32
    %283 = vector.broadcast %c132_i32_111 : i32 to vector<4x1xi32>
    %284 = arith.addi %282, %283 : vector<4x1xi32>
    %285 = vector.broadcast %284 : vector<4x1xi32> to vector<4x264xi32>
    %286 = vector.broadcast %0 : vector<1x264xi32> to vector<4x264xi32>
    %287 = arith.cmpi eq, %285, %286 : vector<4x264xi32>
    %cst_112 = arith.constant 1.000000e+00 : f32
    %cst_113 = arith.constant 0.000000e+00 : f32
    %288 = vector.broadcast %cst_112 : f32 to vector<4x264xf32>
    %289 = vector.broadcast %cst_113 : f32 to vector<4x264xf32>
    %290 = arith.select %287, %288, %289 : vector<4x264xi1>, vector<4x264xf32>
    %291 = arith.addf %281, %290 : vector<4x264xf32>
    %c0_114 = arith.constant 0 : index
    %c29 = arith.constant 29 : index
    %292 = vector.load %arg0[%c0_114, %c29] : memref<4x34xi32, #tpu.memory_space<vmem>>, vector<4x1xi32>
    %c132_i32_115 = arith.constant 132 : i32
    %293 = vector.broadcast %c132_i32_115 : i32 to vector<4x1xi32>
    %294 = arith.addi %292, %293 : vector<4x1xi32>
    %295 = vector.broadcast %294 : vector<4x1xi32> to vector<4x264xi32>
    %296 = vector.broadcast %0 : vector<1x264xi32> to vector<4x264xi32>
    %297 = arith.cmpi eq, %295, %296 : vector<4x264xi32>
    %cst_116 = arith.constant 1.000000e+00 : f32
    %cst_117 = arith.constant 0.000000e+00 : f32
    %298 = vector.broadcast %cst_116 : f32 to vector<4x264xf32>
    %299 = vector.broadcast %cst_117 : f32 to vector<4x264xf32>
    %300 = arith.select %297, %298, %299 : vector<4x264xi1>, vector<4x264xf32>
    %301 = arith.addf %291, %300 : vector<4x264xf32>
    %c0_118 = arith.constant 0 : index
    %c30 = arith.constant 30 : index
    %302 = vector.load %arg0[%c0_118, %c30] : memref<4x34xi32, #tpu.memory_space<vmem>>, vector<4x1xi32>
    %c132_i32_119 = arith.constant 132 : i32
    %303 = vector.broadcast %c132_i32_119 : i32 to vector<4x1xi32>
    %304 = arith.addi %302, %303 : vector<4x1xi32>
    %305 = vector.broadcast %304 : vector<4x1xi32> to vector<4x264xi32>
    %306 = vector.broadcast %0 : vector<1x264xi32> to vector<4x264xi32>
    %307 = arith.cmpi eq, %305, %306 : vector<4x264xi32>
    %cst_120 = arith.constant 1.000000e+00 : f32
    %cst_121 = arith.constant 0.000000e+00 : f32
    %308 = vector.broadcast %cst_120 : f32 to vector<4x264xf32>
    %309 = vector.broadcast %cst_121 : f32 to vector<4x264xf32>
    %310 = arith.select %307, %308, %309 : vector<4x264xi1>, vector<4x264xf32>
    %311 = arith.addf %301, %310 : vector<4x264xf32>
    %c0_122 = arith.constant 0 : index
    %c31 = arith.constant 31 : index
    %312 = vector.load %arg0[%c0_122, %c31] : memref<4x34xi32, #tpu.memory_space<vmem>>, vector<4x1xi32>
    %c132_i32_123 = arith.constant 132 : i32
    %313 = vector.broadcast %c132_i32_123 : i32 to vector<4x1xi32>
    %314 = arith.addi %312, %313 : vector<4x1xi32>
    %315 = vector.broadcast %314 : vector<4x1xi32> to vector<4x264xi32>
    %316 = vector.broadcast %0 : vector<1x264xi32> to vector<4x264xi32>
    %317 = arith.cmpi eq, %315, %316 : vector<4x264xi32>
    %cst_124 = arith.constant 1.000000e+00 : f32
    %cst_125 = arith.constant 0.000000e+00 : f32
    %318 = vector.broadcast %cst_124 : f32 to vector<4x264xf32>
    %319 = vector.broadcast %cst_125 : f32 to vector<4x264xf32>
    %320 = arith.select %317, %318, %319 : vector<4x264xi1>, vector<4x264xf32>
    %321 = arith.addf %311, %320 : vector<4x264xf32>
    %c0_126 = arith.constant 0 : index
    %c32 = arith.constant 32 : index
    %322 = vector.load %arg0[%c0_126, %c32] : memref<4x34xi32, #tpu.memory_space<vmem>>, vector<4x1xi32>
    %c132_i32_127 = arith.constant 132 : i32
    %323 = vector.broadcast %c132_i32_127 : i32 to vector<4x1xi32>
    %324 = arith.addi %322, %323 : vector<4x1xi32>
    %325 = vector.broadcast %324 : vector<4x1xi32> to vector<4x264xi32>
    %326 = vector.broadcast %0 : vector<1x264xi32> to vector<4x264xi32>
    %327 = arith.cmpi eq, %325, %326 : vector<4x264xi32>
    %cst_128 = arith.constant 1.000000e+00 : f32
    %cst_129 = arith.constant 0.000000e+00 : f32
    %328 = vector.broadcast %cst_128 : f32 to vector<4x264xf32>
    %329 = vector.broadcast %cst_129 : f32 to vector<4x264xf32>
    %330 = arith.select %327, %328, %329 : vector<4x264xi1>, vector<4x264xf32>
    %331 = arith.addf %321, %330 : vector<4x264xf32>
    %c0_130 = arith.constant 0 : index
    %c33 = arith.constant 33 : index
    %332 = vector.load %arg0[%c0_130, %c33] : memref<4x34xi32, #tpu.memory_space<vmem>>, vector<4x1xi32>
    %c132_i32_131 = arith.constant 132 : i32
    %333 = vector.broadcast %c132_i32_131 : i32 to vector<4x1xi32>
    %334 = arith.addi %332, %333 : vector<4x1xi32>
    %335 = vector.broadcast %334 : vector<4x1xi32> to vector<4x264xi32>
    %336 = vector.broadcast %0 : vector<1x264xi32> to vector<4x264xi32>
    %337 = arith.cmpi eq, %335, %336 : vector<4x264xi32>
    %cst_132 = arith.constant 1.000000e+00 : f32
    %cst_133 = arith.constant 0.000000e+00 : f32
    %338 = vector.broadcast %cst_132 : f32 to vector<4x264xf32>
    %339 = vector.broadcast %cst_133 : f32 to vector<4x264xf32>
    %340 = arith.select %337, %338, %339 : vector<4x264xi1>, vector<4x264xf32>
    %341 = arith.addf %331, %340 : vector<4x264xf32>
    %c0_134 = arith.constant 0 : index
    %c0_135 = arith.constant 0 : index
    %342 = vector.load %arg1[%c0_134, %c0_135] : memref<4x32xi32, #tpu.memory_space<vmem>>, vector<4x1xi32>
    %c67_i32 = arith.constant 67 : i32
    %343 = vector.broadcast %c67_i32 : i32 to vector<4x1xi32>
    %344 = arith.addi %342, %343 : vector<4x1xi32>
    %345 = vector.broadcast %344 : vector<4x1xi32> to vector<4x264xi32>
    %346 = vector.broadcast %0 : vector<1x264xi32> to vector<4x264xi32>
    %347 = arith.cmpi eq, %345, %346 : vector<4x264xi32>
    %cst_136 = arith.constant 1.000000e+00 : f32
    %cst_137 = arith.constant 0.000000e+00 : f32
    %348 = vector.broadcast %cst_136 : f32 to vector<4x264xf32>
    %349 = vector.broadcast %cst_137 : f32 to vector<4x264xf32>
    %350 = arith.select %347, %348, %349 : vector<4x264xi1>, vector<4x264xf32>
    %351 = arith.addf %341, %350 : vector<4x264xf32>
    %c0_138 = arith.constant 0 : index
    %c1_139 = arith.constant 1 : index
    %352 = vector.load %arg1[%c0_138, %c1_139] : memref<4x32xi32, #tpu.memory_space<vmem>>, vector<4x1xi32>
    %c67_i32_140 = arith.constant 67 : i32
    %353 = vector.broadcast %c67_i32_140 : i32 to vector<4x1xi32>
    %354 = arith.addi %352, %353 : vector<4x1xi32>
    %355 = vector.broadcast %354 : vector<4x1xi32> to vector<4x264xi32>
    %356 = vector.broadcast %0 : vector<1x264xi32> to vector<4x264xi32>
    %357 = arith.cmpi eq, %355, %356 : vector<4x264xi32>
    %cst_141 = arith.constant 1.000000e+00 : f32
    %cst_142 = arith.constant 0.000000e+00 : f32
    %358 = vector.broadcast %cst_141 : f32 to vector<4x264xf32>
    %359 = vector.broadcast %cst_142 : f32 to vector<4x264xf32>
    %360 = arith.select %357, %358, %359 : vector<4x264xi1>, vector<4x264xf32>
    %361 = arith.addf %351, %360 : vector<4x264xf32>
    %c0_143 = arith.constant 0 : index
    %c2_144 = arith.constant 2 : index
    %362 = vector.load %arg1[%c0_143, %c2_144] : memref<4x32xi32, #tpu.memory_space<vmem>>, vector<4x1xi32>
    %c67_i32_145 = arith.constant 67 : i32
    %363 = vector.broadcast %c67_i32_145 : i32 to vector<4x1xi32>
    %364 = arith.addi %362, %363 : vector<4x1xi32>
    %365 = vector.broadcast %364 : vector<4x1xi32> to vector<4x264xi32>
    %366 = vector.broadcast %0 : vector<1x264xi32> to vector<4x264xi32>
    %367 = arith.cmpi eq, %365, %366 : vector<4x264xi32>
    %cst_146 = arith.constant 1.000000e+00 : f32
    %cst_147 = arith.constant 0.000000e+00 : f32
    %368 = vector.broadcast %cst_146 : f32 to vector<4x264xf32>
    %369 = vector.broadcast %cst_147 : f32 to vector<4x264xf32>
    %370 = arith.select %367, %368, %369 : vector<4x264xi1>, vector<4x264xf32>
    %371 = arith.addf %361, %370 : vector<4x264xf32>
    %c0_148 = arith.constant 0 : index
    %c3_149 = arith.constant 3 : index
    %372 = vector.load %arg1[%c0_148, %c3_149] : memref<4x32xi32, #tpu.memory_space<vmem>>, vector<4x1xi32>
    %c67_i32_150 = arith.constant 67 : i32
    %373 = vector.broadcast %c67_i32_150 : i32 to vector<4x1xi32>
    %374 = arith.addi %372, %373 : vector<4x1xi32>
    %375 = vector.broadcast %374 : vector<4x1xi32> to vector<4x264xi32>
    %376 = vector.broadcast %0 : vector<1x264xi32> to vector<4x264xi32>
    %377 = arith.cmpi eq, %375, %376 : vector<4x264xi32>
    %cst_151 = arith.constant 1.000000e+00 : f32
    %cst_152 = arith.constant 0.000000e+00 : f32
    %378 = vector.broadcast %cst_151 : f32 to vector<4x264xf32>
    %379 = vector.broadcast %cst_152 : f32 to vector<4x264xf32>
    %380 = arith.select %377, %378, %379 : vector<4x264xi1>, vector<4x264xf32>
    %381 = arith.addf %371, %380 : vector<4x264xf32>
    %c0_153 = arith.constant 0 : index
    %c4_154 = arith.constant 4 : index
    %382 = vector.load %arg1[%c0_153, %c4_154] : memref<4x32xi32, #tpu.memory_space<vmem>>, vector<4x1xi32>
    %c67_i32_155 = arith.constant 67 : i32
    %383 = vector.broadcast %c67_i32_155 : i32 to vector<4x1xi32>
    %384 = arith.addi %382, %383 : vector<4x1xi32>
    %385 = vector.broadcast %384 : vector<4x1xi32> to vector<4x264xi32>
    %386 = vector.broadcast %0 : vector<1x264xi32> to vector<4x264xi32>
    %387 = arith.cmpi eq, %385, %386 : vector<4x264xi32>
    %cst_156 = arith.constant 1.000000e+00 : f32
    %cst_157 = arith.constant 0.000000e+00 : f32
    %388 = vector.broadcast %cst_156 : f32 to vector<4x264xf32>
    %389 = vector.broadcast %cst_157 : f32 to vector<4x264xf32>
    %390 = arith.select %387, %388, %389 : vector<4x264xi1>, vector<4x264xf32>
    %391 = arith.addf %381, %390 : vector<4x264xf32>
    %c0_158 = arith.constant 0 : index
    %c5_159 = arith.constant 5 : index
    %392 = vector.load %arg1[%c0_158, %c5_159] : memref<4x32xi32, #tpu.memory_space<vmem>>, vector<4x1xi32>
    %c67_i32_160 = arith.constant 67 : i32
    %393 = vector.broadcast %c67_i32_160 : i32 to vector<4x1xi32>
    %394 = arith.addi %392, %393 : vector<4x1xi32>
    %395 = vector.broadcast %394 : vector<4x1xi32> to vector<4x264xi32>
    %396 = vector.broadcast %0 : vector<1x264xi32> to vector<4x264xi32>
    %397 = arith.cmpi eq, %395, %396 : vector<4x264xi32>
    %cst_161 = arith.constant 1.000000e+00 : f32
    %cst_162 = arith.constant 0.000000e+00 : f32
    %398 = vector.broadcast %cst_161 : f32 to vector<4x264xf32>
    %399 = vector.broadcast %cst_162 : f32 to vector<4x264xf32>
    %400 = arith.select %397, %398, %399 : vector<4x264xi1>, vector<4x264xf32>
    %401 = arith.addf %391, %400 : vector<4x264xf32>
    %c0_163 = arith.constant 0 : index
    %c6_164 = arith.constant 6 : index
    %402 = vector.load %arg1[%c0_163, %c6_164] : memref<4x32xi32, #tpu.memory_space<vmem>>, vector<4x1xi32>
    %c67_i32_165 = arith.constant 67 : i32
    %403 = vector.broadcast %c67_i32_165 : i32 to vector<4x1xi32>
    %404 = arith.addi %402, %403 : vector<4x1xi32>
    %405 = vector.broadcast %404 : vector<4x1xi32> to vector<4x264xi32>
    %406 = vector.broadcast %0 : vector<1x264xi32> to vector<4x264xi32>
    %407 = arith.cmpi eq, %405, %406 : vector<4x264xi32>
    %cst_166 = arith.constant 1.000000e+00 : f32
    %cst_167 = arith.constant 0.000000e+00 : f32
    %408 = vector.broadcast %cst_166 : f32 to vector<4x264xf32>
    %409 = vector.broadcast %cst_167 : f32 to vector<4x264xf32>
    %410 = arith.select %407, %408, %409 : vector<4x264xi1>, vector<4x264xf32>
    %411 = arith.addf %401, %410 : vector<4x264xf32>
    %c0_168 = arith.constant 0 : index
    %c7_169 = arith.constant 7 : index
    %412 = vector.load %arg1[%c0_168, %c7_169] : memref<4x32xi32, #tpu.memory_space<vmem>>, vector<4x1xi32>
    %c67_i32_170 = arith.constant 67 : i32
    %413 = vector.broadcast %c67_i32_170 : i32 to vector<4x1xi32>
    %414 = arith.addi %412, %413 : vector<4x1xi32>
    %415 = vector.broadcast %414 : vector<4x1xi32> to vector<4x264xi32>
    %416 = vector.broadcast %0 : vector<1x264xi32> to vector<4x264xi32>
    %417 = arith.cmpi eq, %415, %416 : vector<4x264xi32>
    %cst_171 = arith.constant 1.000000e+00 : f32
    %cst_172 = arith.constant 0.000000e+00 : f32
    %418 = vector.broadcast %cst_171 : f32 to vector<4x264xf32>
    %419 = vector.broadcast %cst_172 : f32 to vector<4x264xf32>
    %420 = arith.select %417, %418, %419 : vector<4x264xi1>, vector<4x264xf32>
    %421 = arith.addf %411, %420 : vector<4x264xf32>
    %c0_173 = arith.constant 0 : index
    %c8_174 = arith.constant 8 : index
    %422 = vector.load %arg1[%c0_173, %c8_174] : memref<4x32xi32, #tpu.memory_space<vmem>>, vector<4x1xi32>
    %c67_i32_175 = arith.constant 67 : i32
    %423 = vector.broadcast %c67_i32_175 : i32 to vector<4x1xi32>
    %424 = arith.addi %422, %423 : vector<4x1xi32>
    %425 = vector.broadcast %424 : vector<4x1xi32> to vector<4x264xi32>
    %426 = vector.broadcast %0 : vector<1x264xi32> to vector<4x264xi32>
    %427 = arith.cmpi eq, %425, %426 : vector<4x264xi32>
    %cst_176 = arith.constant 1.000000e+00 : f32
    %cst_177 = arith.constant 0.000000e+00 : f32
    %428 = vector.broadcast %cst_176 : f32 to vector<4x264xf32>
    %429 = vector.broadcast %cst_177 : f32 to vector<4x264xf32>
    %430 = arith.select %427, %428, %429 : vector<4x264xi1>, vector<4x264xf32>
    %431 = arith.addf %421, %430 : vector<4x264xf32>
    %c0_178 = arith.constant 0 : index
    %c9_179 = arith.constant 9 : index
    %432 = vector.load %arg1[%c0_178, %c9_179] : memref<4x32xi32, #tpu.memory_space<vmem>>, vector<4x1xi32>
    %c67_i32_180 = arith.constant 67 : i32
    %433 = vector.broadcast %c67_i32_180 : i32 to vector<4x1xi32>
    %434 = arith.addi %432, %433 : vector<4x1xi32>
    %435 = vector.broadcast %434 : vector<4x1xi32> to vector<4x264xi32>
    %436 = vector.broadcast %0 : vector<1x264xi32> to vector<4x264xi32>
    %437 = arith.cmpi eq, %435, %436 : vector<4x264xi32>
    %cst_181 = arith.constant 1.000000e+00 : f32
    %cst_182 = arith.constant 0.000000e+00 : f32
    %438 = vector.broadcast %cst_181 : f32 to vector<4x264xf32>
    %439 = vector.broadcast %cst_182 : f32 to vector<4x264xf32>
    %440 = arith.select %437, %438, %439 : vector<4x264xi1>, vector<4x264xf32>
    %441 = arith.addf %431, %440 : vector<4x264xf32>
    %c0_183 = arith.constant 0 : index
    %c10_184 = arith.constant 10 : index
    %442 = vector.load %arg1[%c0_183, %c10_184] : memref<4x32xi32, #tpu.memory_space<vmem>>, vector<4x1xi32>
    %c67_i32_185 = arith.constant 67 : i32
    %443 = vector.broadcast %c67_i32_185 : i32 to vector<4x1xi32>
    %444 = arith.addi %442, %443 : vector<4x1xi32>
    %445 = vector.broadcast %444 : vector<4x1xi32> to vector<4x264xi32>
    %446 = vector.broadcast %0 : vector<1x264xi32> to vector<4x264xi32>
    %447 = arith.cmpi eq, %445, %446 : vector<4x264xi32>
    %cst_186 = arith.constant 1.000000e+00 : f32
    %cst_187 = arith.constant 0.000000e+00 : f32
    %448 = vector.broadcast %cst_186 : f32 to vector<4x264xf32>
    %449 = vector.broadcast %cst_187 : f32 to vector<4x264xf32>
    %450 = arith.select %447, %448, %449 : vector<4x264xi1>, vector<4x264xf32>
    %451 = arith.addf %441, %450 : vector<4x264xf32>
    %c0_188 = arith.constant 0 : index
    %c11_189 = arith.constant 11 : index
    %452 = vector.load %arg1[%c0_188, %c11_189] : memref<4x32xi32, #tpu.memory_space<vmem>>, vector<4x1xi32>
    %c67_i32_190 = arith.constant 67 : i32
    %453 = vector.broadcast %c67_i32_190 : i32 to vector<4x1xi32>
    %454 = arith.addi %452, %453 : vector<4x1xi32>
    %455 = vector.broadcast %454 : vector<4x1xi32> to vector<4x264xi32>
    %456 = vector.broadcast %0 : vector<1x264xi32> to vector<4x264xi32>
    %457 = arith.cmpi eq, %455, %456 : vector<4x264xi32>
    %cst_191 = arith.constant 1.000000e+00 : f32
    %cst_192 = arith.constant 0.000000e+00 : f32
    %458 = vector.broadcast %cst_191 : f32 to vector<4x264xf32>
    %459 = vector.broadcast %cst_192 : f32 to vector<4x264xf32>
    %460 = arith.select %457, %458, %459 : vector<4x264xi1>, vector<4x264xf32>
    %461 = arith.addf %451, %460 : vector<4x264xf32>
    %c0_193 = arith.constant 0 : index
    %c12_194 = arith.constant 12 : index
    %462 = vector.load %arg1[%c0_193, %c12_194] : memref<4x32xi32, #tpu.memory_space<vmem>>, vector<4x1xi32>
    %c67_i32_195 = arith.constant 67 : i32
    %463 = vector.broadcast %c67_i32_195 : i32 to vector<4x1xi32>
    %464 = arith.addi %462, %463 : vector<4x1xi32>
    %465 = vector.broadcast %464 : vector<4x1xi32> to vector<4x264xi32>
    %466 = vector.broadcast %0 : vector<1x264xi32> to vector<4x264xi32>
    %467 = arith.cmpi eq, %465, %466 : vector<4x264xi32>
    %cst_196 = arith.constant 1.000000e+00 : f32
    %cst_197 = arith.constant 0.000000e+00 : f32
    %468 = vector.broadcast %cst_196 : f32 to vector<4x264xf32>
    %469 = vector.broadcast %cst_197 : f32 to vector<4x264xf32>
    %470 = arith.select %467, %468, %469 : vector<4x264xi1>, vector<4x264xf32>
    %471 = arith.addf %461, %470 : vector<4x264xf32>
    %c0_198 = arith.constant 0 : index
    %c13_199 = arith.constant 13 : index
    %472 = vector.load %arg1[%c0_198, %c13_199] : memref<4x32xi32, #tpu.memory_space<vmem>>, vector<4x1xi32>
    %c67_i32_200 = arith.constant 67 : i32
    %473 = vector.broadcast %c67_i32_200 : i32 to vector<4x1xi32>
    %474 = arith.addi %472, %473 : vector<4x1xi32>
    %475 = vector.broadcast %474 : vector<4x1xi32> to vector<4x264xi32>
    %476 = vector.broadcast %0 : vector<1x264xi32> to vector<4x264xi32>
    %477 = arith.cmpi eq, %475, %476 : vector<4x264xi32>
    %cst_201 = arith.constant 1.000000e+00 : f32
    %cst_202 = arith.constant 0.000000e+00 : f32
    %478 = vector.broadcast %cst_201 : f32 to vector<4x264xf32>
    %479 = vector.broadcast %cst_202 : f32 to vector<4x264xf32>
    %480 = arith.select %477, %478, %479 : vector<4x264xi1>, vector<4x264xf32>
    %481 = arith.addf %471, %480 : vector<4x264xf32>
    %c0_203 = arith.constant 0 : index
    %c14_204 = arith.constant 14 : index
    %482 = vector.load %arg1[%c0_203, %c14_204] : memref<4x32xi32, #tpu.memory_space<vmem>>, vector<4x1xi32>
    %c67_i32_205 = arith.constant 67 : i32
    %483 = vector.broadcast %c67_i32_205 : i32 to vector<4x1xi32>
    %484 = arith.addi %482, %483 : vector<4x1xi32>
    %485 = vector.broadcast %484 : vector<4x1xi32> to vector<4x264xi32>
    %486 = vector.broadcast %0 : vector<1x264xi32> to vector<4x264xi32>
    %487 = arith.cmpi eq, %485, %486 : vector<4x264xi32>
    %cst_206 = arith.constant 1.000000e+00 : f32
    %cst_207 = arith.constant 0.000000e+00 : f32
    %488 = vector.broadcast %cst_206 : f32 to vector<4x264xf32>
    %489 = vector.broadcast %cst_207 : f32 to vector<4x264xf32>
    %490 = arith.select %487, %488, %489 : vector<4x264xi1>, vector<4x264xf32>
    %491 = arith.addf %481, %490 : vector<4x264xf32>
    %c0_208 = arith.constant 0 : index
    %c15_209 = arith.constant 15 : index
    %492 = vector.load %arg1[%c0_208, %c15_209] : memref<4x32xi32, #tpu.memory_space<vmem>>, vector<4x1xi32>
    %c67_i32_210 = arith.constant 67 : i32
    %493 = vector.broadcast %c67_i32_210 : i32 to vector<4x1xi32>
    %494 = arith.addi %492, %493 : vector<4x1xi32>
    %495 = vector.broadcast %494 : vector<4x1xi32> to vector<4x264xi32>
    %496 = vector.broadcast %0 : vector<1x264xi32> to vector<4x264xi32>
    %497 = arith.cmpi eq, %495, %496 : vector<4x264xi32>
    %cst_211 = arith.constant 1.000000e+00 : f32
    %cst_212 = arith.constant 0.000000e+00 : f32
    %498 = vector.broadcast %cst_211 : f32 to vector<4x264xf32>
    %499 = vector.broadcast %cst_212 : f32 to vector<4x264xf32>
    %500 = arith.select %497, %498, %499 : vector<4x264xi1>, vector<4x264xf32>
    %501 = arith.addf %491, %500 : vector<4x264xf32>
    %c0_213 = arith.constant 0 : index
    %c16_214 = arith.constant 16 : index
    %502 = vector.load %arg1[%c0_213, %c16_214] : memref<4x32xi32, #tpu.memory_space<vmem>>, vector<4x1xi32>
    %c199_i32 = arith.constant 199 : i32
    %503 = vector.broadcast %c199_i32 : i32 to vector<4x1xi32>
    %504 = arith.addi %502, %503 : vector<4x1xi32>
    %505 = vector.broadcast %504 : vector<4x1xi32> to vector<4x264xi32>
    %506 = vector.broadcast %0 : vector<1x264xi32> to vector<4x264xi32>
    %507 = arith.cmpi eq, %505, %506 : vector<4x264xi32>
    %cst_215 = arith.constant 1.000000e+00 : f32
    %cst_216 = arith.constant 0.000000e+00 : f32
    %508 = vector.broadcast %cst_215 : f32 to vector<4x264xf32>
    %509 = vector.broadcast %cst_216 : f32 to vector<4x264xf32>
    %510 = arith.select %507, %508, %509 : vector<4x264xi1>, vector<4x264xf32>
    %511 = arith.addf %501, %510 : vector<4x264xf32>
    %c0_217 = arith.constant 0 : index
    %c17_218 = arith.constant 17 : index
    %512 = vector.load %arg1[%c0_217, %c17_218] : memref<4x32xi32, #tpu.memory_space<vmem>>, vector<4x1xi32>
    %c199_i32_219 = arith.constant 199 : i32
    %513 = vector.broadcast %c199_i32_219 : i32 to vector<4x1xi32>
    %514 = arith.addi %512, %513 : vector<4x1xi32>
    %515 = vector.broadcast %514 : vector<4x1xi32> to vector<4x264xi32>
    %516 = vector.broadcast %0 : vector<1x264xi32> to vector<4x264xi32>
    %517 = arith.cmpi eq, %515, %516 : vector<4x264xi32>
    %cst_220 = arith.constant 1.000000e+00 : f32
    %cst_221 = arith.constant 0.000000e+00 : f32
    %518 = vector.broadcast %cst_220 : f32 to vector<4x264xf32>
    %519 = vector.broadcast %cst_221 : f32 to vector<4x264xf32>
    %520 = arith.select %517, %518, %519 : vector<4x264xi1>, vector<4x264xf32>
    %521 = arith.addf %511, %520 : vector<4x264xf32>
    %c0_222 = arith.constant 0 : index
    %c18_223 = arith.constant 18 : index
    %522 = vector.load %arg1[%c0_222, %c18_223] : memref<4x32xi32, #tpu.memory_space<vmem>>, vector<4x1xi32>
    %c199_i32_224 = arith.constant 199 : i32
    %523 = vector.broadcast %c199_i32_224 : i32 to vector<4x1xi32>
    %524 = arith.addi %522, %523 : vector<4x1xi32>
    %525 = vector.broadcast %524 : vector<4x1xi32> to vector<4x264xi32>
    %526 = vector.broadcast %0 : vector<1x264xi32> to vector<4x264xi32>
    %527 = arith.cmpi eq, %525, %526 : vector<4x264xi32>
    %cst_225 = arith.constant 1.000000e+00 : f32
    %cst_226 = arith.constant 0.000000e+00 : f32
    %528 = vector.broadcast %cst_225 : f32 to vector<4x264xf32>
    %529 = vector.broadcast %cst_226 : f32 to vector<4x264xf32>
    %530 = arith.select %527, %528, %529 : vector<4x264xi1>, vector<4x264xf32>
    %531 = arith.addf %521, %530 : vector<4x264xf32>
    %c0_227 = arith.constant 0 : index
    %c19_228 = arith.constant 19 : index
    %532 = vector.load %arg1[%c0_227, %c19_228] : memref<4x32xi32, #tpu.memory_space<vmem>>, vector<4x1xi32>
    %c199_i32_229 = arith.constant 199 : i32
    %533 = vector.broadcast %c199_i32_229 : i32 to vector<4x1xi32>
    %534 = arith.addi %532, %533 : vector<4x1xi32>
    %535 = vector.broadcast %534 : vector<4x1xi32> to vector<4x264xi32>
    %536 = vector.broadcast %0 : vector<1x264xi32> to vector<4x264xi32>
    %537 = arith.cmpi eq, %535, %536 : vector<4x264xi32>
    %cst_230 = arith.constant 1.000000e+00 : f32
    %cst_231 = arith.constant 0.000000e+00 : f32
    %538 = vector.broadcast %cst_230 : f32 to vector<4x264xf32>
    %539 = vector.broadcast %cst_231 : f32 to vector<4x264xf32>
    %540 = arith.select %537, %538, %539 : vector<4x264xi1>, vector<4x264xf32>
    %541 = arith.addf %531, %540 : vector<4x264xf32>
    %c0_232 = arith.constant 0 : index
    %c20_233 = arith.constant 20 : index
    %542 = vector.load %arg1[%c0_232, %c20_233] : memref<4x32xi32, #tpu.memory_space<vmem>>, vector<4x1xi32>
    %c199_i32_234 = arith.constant 199 : i32
    %543 = vector.broadcast %c199_i32_234 : i32 to vector<4x1xi32>
    %544 = arith.addi %542, %543 : vector<4x1xi32>
    %545 = vector.broadcast %544 : vector<4x1xi32> to vector<4x264xi32>
    %546 = vector.broadcast %0 : vector<1x264xi32> to vector<4x264xi32>
    %547 = arith.cmpi eq, %545, %546 : vector<4x264xi32>
    %cst_235 = arith.constant 1.000000e+00 : f32
    %cst_236 = arith.constant 0.000000e+00 : f32
    %548 = vector.broadcast %cst_235 : f32 to vector<4x264xf32>
    %549 = vector.broadcast %cst_236 : f32 to vector<4x264xf32>
    %550 = arith.select %547, %548, %549 : vector<4x264xi1>, vector<4x264xf32>
    %551 = arith.addf %541, %550 : vector<4x264xf32>
    %c0_237 = arith.constant 0 : index
    %c21_238 = arith.constant 21 : index
    %552 = vector.load %arg1[%c0_237, %c21_238] : memref<4x32xi32, #tpu.memory_space<vmem>>, vector<4x1xi32>
    %c199_i32_239 = arith.constant 199 : i32
    %553 = vector.broadcast %c199_i32_239 : i32 to vector<4x1xi32>
    %554 = arith.addi %552, %553 : vector<4x1xi32>
    %555 = vector.broadcast %554 : vector<4x1xi32> to vector<4x264xi32>
    %556 = vector.broadcast %0 : vector<1x264xi32> to vector<4x264xi32>
    %557 = arith.cmpi eq, %555, %556 : vector<4x264xi32>
    %cst_240 = arith.constant 1.000000e+00 : f32
    %cst_241 = arith.constant 0.000000e+00 : f32
    %558 = vector.broadcast %cst_240 : f32 to vector<4x264xf32>
    %559 = vector.broadcast %cst_241 : f32 to vector<4x264xf32>
    %560 = arith.select %557, %558, %559 : vector<4x264xi1>, vector<4x264xf32>
    %561 = arith.addf %551, %560 : vector<4x264xf32>
    %c0_242 = arith.constant 0 : index
    %c22_243 = arith.constant 22 : index
    %562 = vector.load %arg1[%c0_242, %c22_243] : memref<4x32xi32, #tpu.memory_space<vmem>>, vector<4x1xi32>
    %c199_i32_244 = arith.constant 199 : i32
    %563 = vector.broadcast %c199_i32_244 : i32 to vector<4x1xi32>
    %564 = arith.addi %562, %563 : vector<4x1xi32>
    %565 = vector.broadcast %564 : vector<4x1xi32> to vector<4x264xi32>
    %566 = vector.broadcast %0 : vector<1x264xi32> to vector<4x264xi32>
    %567 = arith.cmpi eq, %565, %566 : vector<4x264xi32>
    %cst_245 = arith.constant 1.000000e+00 : f32
    %cst_246 = arith.constant 0.000000e+00 : f32
    %568 = vector.broadcast %cst_245 : f32 to vector<4x264xf32>
    %569 = vector.broadcast %cst_246 : f32 to vector<4x264xf32>
    %570 = arith.select %567, %568, %569 : vector<4x264xi1>, vector<4x264xf32>
    %571 = arith.addf %561, %570 : vector<4x264xf32>
    %c0_247 = arith.constant 0 : index
    %c23_248 = arith.constant 23 : index
    %572 = vector.load %arg1[%c0_247, %c23_248] : memref<4x32xi32, #tpu.memory_space<vmem>>, vector<4x1xi32>
    %c199_i32_249 = arith.constant 199 : i32
    %573 = vector.broadcast %c199_i32_249 : i32 to vector<4x1xi32>
    %574 = arith.addi %572, %573 : vector<4x1xi32>
    %575 = vector.broadcast %574 : vector<4x1xi32> to vector<4x264xi32>
    %576 = vector.broadcast %0 : vector<1x264xi32> to vector<4x264xi32>
    %577 = arith.cmpi eq, %575, %576 : vector<4x264xi32>
    %cst_250 = arith.constant 1.000000e+00 : f32
    %cst_251 = arith.constant 0.000000e+00 : f32
    %578 = vector.broadcast %cst_250 : f32 to vector<4x264xf32>
    %579 = vector.broadcast %cst_251 : f32 to vector<4x264xf32>
    %580 = arith.select %577, %578, %579 : vector<4x264xi1>, vector<4x264xf32>
    %581 = arith.addf %571, %580 : vector<4x264xf32>
    %c0_252 = arith.constant 0 : index
    %c24_253 = arith.constant 24 : index
    %582 = vector.load %arg1[%c0_252, %c24_253] : memref<4x32xi32, #tpu.memory_space<vmem>>, vector<4x1xi32>
    %c199_i32_254 = arith.constant 199 : i32
    %583 = vector.broadcast %c199_i32_254 : i32 to vector<4x1xi32>
    %584 = arith.addi %582, %583 : vector<4x1xi32>
    %585 = vector.broadcast %584 : vector<4x1xi32> to vector<4x264xi32>
    %586 = vector.broadcast %0 : vector<1x264xi32> to vector<4x264xi32>
    %587 = arith.cmpi eq, %585, %586 : vector<4x264xi32>
    %cst_255 = arith.constant 1.000000e+00 : f32
    %cst_256 = arith.constant 0.000000e+00 : f32
    %588 = vector.broadcast %cst_255 : f32 to vector<4x264xf32>
    %589 = vector.broadcast %cst_256 : f32 to vector<4x264xf32>
    %590 = arith.select %587, %588, %589 : vector<4x264xi1>, vector<4x264xf32>
    %591 = arith.addf %581, %590 : vector<4x264xf32>
    %c0_257 = arith.constant 0 : index
    %c25_258 = arith.constant 25 : index
    %592 = vector.load %arg1[%c0_257, %c25_258] : memref<4x32xi32, #tpu.memory_space<vmem>>, vector<4x1xi32>
    %c199_i32_259 = arith.constant 199 : i32
    %593 = vector.broadcast %c199_i32_259 : i32 to vector<4x1xi32>
    %594 = arith.addi %592, %593 : vector<4x1xi32>
    %595 = vector.broadcast %594 : vector<4x1xi32> to vector<4x264xi32>
    %596 = vector.broadcast %0 : vector<1x264xi32> to vector<4x264xi32>
    %597 = arith.cmpi eq, %595, %596 : vector<4x264xi32>
    %cst_260 = arith.constant 1.000000e+00 : f32
    %cst_261 = arith.constant 0.000000e+00 : f32
    %598 = vector.broadcast %cst_260 : f32 to vector<4x264xf32>
    %599 = vector.broadcast %cst_261 : f32 to vector<4x264xf32>
    %600 = arith.select %597, %598, %599 : vector<4x264xi1>, vector<4x264xf32>
    %601 = arith.addf %591, %600 : vector<4x264xf32>
    %c0_262 = arith.constant 0 : index
    %c26_263 = arith.constant 26 : index
    %602 = vector.load %arg1[%c0_262, %c26_263] : memref<4x32xi32, #tpu.memory_space<vmem>>, vector<4x1xi32>
    %c199_i32_264 = arith.constant 199 : i32
    %603 = vector.broadcast %c199_i32_264 : i32 to vector<4x1xi32>
    %604 = arith.addi %602, %603 : vector<4x1xi32>
    %605 = vector.broadcast %604 : vector<4x1xi32> to vector<4x264xi32>
    %606 = vector.broadcast %0 : vector<1x264xi32> to vector<4x264xi32>
    %607 = arith.cmpi eq, %605, %606 : vector<4x264xi32>
    %cst_265 = arith.constant 1.000000e+00 : f32
    %cst_266 = arith.constant 0.000000e+00 : f32
    %608 = vector.broadcast %cst_265 : f32 to vector<4x264xf32>
    %609 = vector.broadcast %cst_266 : f32 to vector<4x264xf32>
    %610 = arith.select %607, %608, %609 : vector<4x264xi1>, vector<4x264xf32>
    %611 = arith.addf %601, %610 : vector<4x264xf32>
    %c0_267 = arith.constant 0 : index
    %c27_268 = arith.constant 27 : index
    %612 = vector.load %arg1[%c0_267, %c27_268] : memref<4x32xi32, #tpu.memory_space<vmem>>, vector<4x1xi32>
    %c199_i32_269 = arith.constant 199 : i32
    %613 = vector.broadcast %c199_i32_269 : i32 to vector<4x1xi32>
    %614 = arith.addi %612, %613 : vector<4x1xi32>
    %615 = vector.broadcast %614 : vector<4x1xi32> to vector<4x264xi32>
    %616 = vector.broadcast %0 : vector<1x264xi32> to vector<4x264xi32>
    %617 = arith.cmpi eq, %615, %616 : vector<4x264xi32>
    %cst_270 = arith.constant 1.000000e+00 : f32
    %cst_271 = arith.constant 0.000000e+00 : f32
    %618 = vector.broadcast %cst_270 : f32 to vector<4x264xf32>
    %619 = vector.broadcast %cst_271 : f32 to vector<4x264xf32>
    %620 = arith.select %617, %618, %619 : vector<4x264xi1>, vector<4x264xf32>
    %621 = arith.addf %611, %620 : vector<4x264xf32>
    %c0_272 = arith.constant 0 : index
    %c28_273 = arith.constant 28 : index
    %622 = vector.load %arg1[%c0_272, %c28_273] : memref<4x32xi32, #tpu.memory_space<vmem>>, vector<4x1xi32>
    %c199_i32_274 = arith.constant 199 : i32
    %623 = vector.broadcast %c199_i32_274 : i32 to vector<4x1xi32>
    %624 = arith.addi %622, %623 : vector<4x1xi32>
    %625 = vector.broadcast %624 : vector<4x1xi32> to vector<4x264xi32>
    %626 = vector.broadcast %0 : vector<1x264xi32> to vector<4x264xi32>
    %627 = arith.cmpi eq, %625, %626 : vector<4x264xi32>
    %cst_275 = arith.constant 1.000000e+00 : f32
    %cst_276 = arith.constant 0.000000e+00 : f32
    %628 = vector.broadcast %cst_275 : f32 to vector<4x264xf32>
    %629 = vector.broadcast %cst_276 : f32 to vector<4x264xf32>
    %630 = arith.select %627, %628, %629 : vector<4x264xi1>, vector<4x264xf32>
    %631 = arith.addf %621, %630 : vector<4x264xf32>
    %c0_277 = arith.constant 0 : index
    %c29_278 = arith.constant 29 : index
    %632 = vector.load %arg1[%c0_277, %c29_278] : memref<4x32xi32, #tpu.memory_space<vmem>>, vector<4x1xi32>
    %c199_i32_279 = arith.constant 199 : i32
    %633 = vector.broadcast %c199_i32_279 : i32 to vector<4x1xi32>
    %634 = arith.addi %632, %633 : vector<4x1xi32>
    %635 = vector.broadcast %634 : vector<4x1xi32> to vector<4x264xi32>
    %636 = vector.broadcast %0 : vector<1x264xi32> to vector<4x264xi32>
    %637 = arith.cmpi eq, %635, %636 : vector<4x264xi32>
    %cst_280 = arith.constant 1.000000e+00 : f32
    %cst_281 = arith.constant 0.000000e+00 : f32
    %638 = vector.broadcast %cst_280 : f32 to vector<4x264xf32>
    %639 = vector.broadcast %cst_281 : f32 to vector<4x264xf32>
    %640 = arith.select %637, %638, %639 : vector<4x264xi1>, vector<4x264xf32>
    %641 = arith.addf %631, %640 : vector<4x264xf32>
    %c0_282 = arith.constant 0 : index
    %c30_283 = arith.constant 30 : index
    %642 = vector.load %arg1[%c0_282, %c30_283] : memref<4x32xi32, #tpu.memory_space<vmem>>, vector<4x1xi32>
    %c199_i32_284 = arith.constant 199 : i32
    %643 = vector.broadcast %c199_i32_284 : i32 to vector<4x1xi32>
    %644 = arith.addi %642, %643 : vector<4x1xi32>
    %645 = vector.broadcast %644 : vector<4x1xi32> to vector<4x264xi32>
    %646 = vector.broadcast %0 : vector<1x264xi32> to vector<4x264xi32>
    %647 = arith.cmpi eq, %645, %646 : vector<4x264xi32>
    %cst_285 = arith.constant 1.000000e+00 : f32
    %cst_286 = arith.constant 0.000000e+00 : f32
    %648 = vector.broadcast %cst_285 : f32 to vector<4x264xf32>
    %649 = vector.broadcast %cst_286 : f32 to vector<4x264xf32>
    %650 = arith.select %647, %648, %649 : vector<4x264xi1>, vector<4x264xf32>
    %651 = arith.addf %641, %650 : vector<4x264xf32>
    %c0_287 = arith.constant 0 : index
    %c31_288 = arith.constant 31 : index
    %652 = vector.load %arg1[%c0_287, %c31_288] : memref<4x32xi32, #tpu.memory_space<vmem>>, vector<4x1xi32>
    %c199_i32_289 = arith.constant 199 : i32
    %653 = vector.broadcast %c199_i32_289 : i32 to vector<4x1xi32>
    %654 = arith.addi %652, %653 : vector<4x1xi32>
    %655 = vector.broadcast %654 : vector<4x1xi32> to vector<4x264xi32>
    %656 = vector.broadcast %0 : vector<1x264xi32> to vector<4x264xi32>
    %657 = arith.cmpi eq, %655, %656 : vector<4x264xi32>
    %cst_290 = arith.constant 1.000000e+00 : f32
    %cst_291 = arith.constant 0.000000e+00 : f32
    %658 = vector.broadcast %cst_290 : f32 to vector<4x264xf32>
    %659 = vector.broadcast %cst_291 : f32 to vector<4x264xf32>
    %660 = arith.select %657, %658, %659 : vector<4x264xi1>, vector<4x264xf32>
    %661 = arith.addf %651, %660 : vector<4x264xf32>
    %c0_292 = arith.constant 0 : index
    %c0_293 = arith.constant 0 : index
    %662 = vector.load %arg2[%c0_292, %c0_293] : memref<264x128xf32, #tpu.memory_space<vmem>>, vector<264x128xf32>
    %cst_294 = arith.constant dense<0.000000e+00> : vector<4x128xf32>
    %663 = tpu.matmul %661, %662, %cst_294 {dimension_numbers = #tpu.dot_dimension_numbers<[1], [0], [0], [1], [0, 0, 1, 1], [], []>} : vector<4x264xf32>, vector<264x128xf32>, vector<4x128xf32> -> vector<4x128xf32>
    %c0_295 = arith.constant 0 : index
    %c0_296 = arith.constant 0 : index
    %664 = vector.load %arg3[%c0_295, %c0_296] : memref<1x128xf32, #tpu.memory_space<vmem>>, vector<1x128xf32>
    %665 = vector.broadcast %664 : vector<1x128xf32> to vector<4x128xf32>
    %666 = arith.addf %663, %665 : vector<4x128xf32>
    %667 = math.tanh %666 : vector<4x128xf32>
    %c0_297 = arith.constant 0 : index
    %c0_298 = arith.constant 0 : index
    %668 = vector.load %arg4[%c0_297, %c0_298] : memref<128x32xf32, #tpu.memory_space<vmem>>, vector<128x32xf32>
    %cst_299 = arith.constant dense<0.000000e+00> : vector<4x32xf32>
    %669 = tpu.matmul %667, %668, %cst_299 {dimension_numbers = #tpu.dot_dimension_numbers<[1], [0], [0], [1], [0, 0, 1, 1], [], []>} : vector<4x128xf32>, vector<128x32xf32>, vector<4x32xf32> -> vector<4x32xf32>
    %c0_300 = arith.constant 0 : index
    %c0_301 = arith.constant 0 : index
    %670 = vector.load %arg5[%c0_300, %c0_301] : memref<1x32xf32, #tpu.memory_space<vmem>>, vector<1x32xf32>
    %671 = vector.broadcast %670 : vector<1x32xf32> to vector<4x32xf32>
    %672 = arith.addf %669, %671 : vector<4x32xf32>
    %cst_302 = arith.constant dense<0.000000e+00> : vector<4xf32>
    %673 = vector.multi_reduction <add>, %672, %cst_302 [1] : vector<4x32xf32> to vector<4xf32>
    %674 = vector.shape_cast %673 : vector<4xf32> to vector<4x1xf32>
    %cst_303 = arith.constant 3.200000e+01 : f32
    %675 = vector.broadcast %cst_303 : f32 to vector<4x1xf32>
    %676 = arith.divf %674, %675 : vector<4x1xf32>
    %677 = vector.broadcast %676 : vector<4x1xf32> to vector<4x32xf32>
    %678 = arith.subf %672, %677 : vector<4x32xf32>
    %679 = arith.mulf %678, %678 : vector<4x32xf32>
    %cst_304 = arith.constant dense<0.000000e+00> : vector<4xf32>
    %680 = vector.multi_reduction <add>, %679, %cst_304 [1] : vector<4x32xf32> to vector<4xf32>
    %681 = vector.shape_cast %680 : vector<4xf32> to vector<4x1xf32>
    %cst_305 = arith.constant 3.200000e+01 : f32
    %682 = vector.broadcast %cst_305 : f32 to vector<4x1xf32>
    %683 = arith.divf %681, %682 : vector<4x1xf32>
    %684 = vector.broadcast %676 : vector<4x1xf32> to vector<4x32xf32>
    %685 = arith.subf %672, %684 : vector<4x32xf32>
    %cst_306 = arith.constant 9.99999974E-6 : f32
    %686 = vector.broadcast %cst_306 : f32 to vector<4x1xf32>
    %687 = arith.addf %683, %686 : vector<4x1xf32>
    %688 = math.rsqrt %687 : vector<4x1xf32>
    %689 = vector.broadcast %688 : vector<4x1xf32> to vector<4x32xf32>
    %690 = arith.mulf %685, %689 : vector<4x32xf32>
    %c0_307 = arith.constant 0 : index
    %c0_308 = arith.constant 0 : index
    %691 = vector.load %arg6[%c0_307, %c0_308] : memref<1x32xf32, #tpu.memory_space<vmem>>, vector<1x32xf32>
    %692 = vector.broadcast %691 : vector<1x32xf32> to vector<4x32xf32>
    %693 = arith.mulf %690, %692 : vector<4x32xf32>
    %c0_309 = arith.constant 0 : index
    %c0_310 = arith.constant 0 : index
    %694 = vector.load %arg7[%c0_309, %c0_310] : memref<1x32xf32, #tpu.memory_space<vmem>>, vector<1x32xf32>
    %695 = vector.broadcast %694 : vector<1x32xf32> to vector<4x32xf32>
    %696 = arith.addf %693, %695 : vector<4x32xf32>
    %cst_311 = arith.constant 0.000000e+00 : f32
    %697 = vector.broadcast %cst_311 : f32 to vector<4x32xf32>
    %698 = arith.maximumf %696, %697 : vector<4x32xf32>
    %c0_312 = arith.constant 0 : index
    %c0_313 = arith.constant 0 : index
    %699 = vector.load %arg8[%c0_312, %c0_313] : memref<1x32xf32, #tpu.memory_space<vmem>>, vector<1x32xf32>
    %700 = vector.broadcast %699 : vector<1x32xf32> to vector<4x32xf32>
    %701 = arith.mulf %698, %700 : vector<4x32xf32>
    %cst_314 = arith.constant dense<0.000000e+00> : vector<4xf32>
    %702 = vector.multi_reduction <add>, %701, %cst_314 [1] : vector<4x32xf32> to vector<4xf32>
    %703 = vector.shape_cast %702 : vector<4xf32> to vector<4x1xf32>
    %c0_315 = arith.constant 0 : index
    %c0_316 = arith.constant 0 : index
    %704 = vector.load %arg9[%c0_315, %c0_316] : memref<1x1xf32, #tpu.memory_space<vmem>>, vector<1x1xf32>
    %705 = vector.broadcast %704 : vector<1x1xf32> to vector<4x1xf32>
    %706 = arith.addf %703, %705 : vector<4x1xf32>
    %707 = arith.negf %706 : vector<4x1xf32>
    %708 = math.exp %707 : vector<4x1xf32>
    %cst_317 = arith.constant 1.000000e+00 : f32
    %709 = vector.broadcast %cst_317 : f32 to vector<4x1xf32>
    %710 = arith.addf %709, %708 : vector<4x1xf32>
    %711 = arith.divf %709, %710 : vector<4x1xf32>
    %c0_318 = arith.constant 0 : index
    %c0_319 = arith.constant 0 : index
    %712 = vector.load %arg11[%c0_318, %c0_319] : memref<4x1xf32, #tpu.memory_space<vmem>>, vector<4x1xf32>
    tpu.vector_store %arg11[%c0_318, %c0_319], %711 {strides = array<i32>} : memref<4x1xf32, #tpu.memory_space<vmem>>, vector<4x1xf32>,
    %c0_320 = arith.constant 0 : index
    %c0_321 = arith.constant 0 : index
    %713 = vector.load %arg11[%c0_320, %c0_321] : memref<4x1xf32, #tpu.memory_space<vmem>>, vector<2x1xf32>
    %c2_322 = arith.constant 2 : index
    %c0_323 = arith.constant 0 : index
    %714 = vector.load %arg11[%c2_322, %c0_323] : memref<4x1xf32, #tpu.memory_space<vmem>>, vector<2x1xf32>
    %715 = arith.addf %713, %714 : vector<2x1xf32>
    %cst_324 = arith.constant 5.000000e-01 : f32
    %716 = vector.broadcast %cst_324 : f32 to vector<2x1xf32>
    %717 = arith.mulf %716, %715 : vector<2x1xf32>
    %c0_325 = arith.constant 0 : index
    %c0_326 = arith.constant 0 : index
    %718 = vector.load %arg10[%c0_325, %c0_326] : memref<2x1xf32, #tpu.memory_space<vmem>>, vector<2x1xf32>
    tpu.vector_store %arg10[%c0_325, %c0_326], %717 {strides = array<i32>} : memref<2x1xf32, #tpu.memory_space<vmem>>, vector<2x1xf32>,
    return
  }
}

</mosaic_0001>

<bundles_post_ra>
// kernel: _lambda_.1
= control target key start
LH: loop header
LB: loop body
LE: loop exit
PB: predicated region body
PF: predicated region fallthrough
CT: control target
= control target key end

     0   :  { %s2098_s0 = inlined_call_operand.vmem [shape: s32[4,34], index: 0, kind: input, shape index: {}]   ;;  %s2099_s1 = inlined_call_operand.vmem [shape: s32[4,32], index: 1, kind: input, shape index: {}]   ;;  %s2100_s2 = inlined_call_operand.hbm [shape: f32[264,128], index: 2, kind: input, shape index: {}]   ;;  %s2101_s3 = inlined_call_operand.vmem [shape: f32[1,128], index: 3, kind: input, shape index: {}]   ;;  %s2102_s4 = inlined_call_operand.hbm [shape: f32[128,32], index: 4, kind: input, shape index: {}]   ;;  %s2103_s5 = inlined_call_operand.vmem [shape: f32[1,32], index: 5, kind: input, shape index: {}, may-alias: {5,7}]   ;;  %s2104_s6 = inlined_call_operand.vmem [shape: f32[1,32], index: 6, kind: input, shape index: {}]   ;;  %s2105_s7 = inlined_call_operand.vmem [shape: f32[1,32], index: 7, kind: input, shape index: {}, may-alias: {5,7}]   ;;  %s2106_s8 = inlined_call_operand.vmem [shape: f32[1,32], index: 8, kind: input, shape index: {}]   ;;  %s2107_s9 = inlined_call_operand.<no memory space> [shape: f32[1,1], index: 9, kind: input, shape index: {}]   ;;  %s2108_s10 = inlined_call_operand.vmem [shape: f32[2,1], index: 10, kind: output, shape index: {}]  }
   0x1   :  { %v15_v0 = vstv %s2107_s9 }
   0x2   :  { %16 = vst [vmem:[#allocation3] sm:$0x1] %v15_v0 }
   0x3   :  { %17 = vsyncpa [#allocation5], 0  ;;  %s27_s17 = sshll.u32 %s2100_s2, 4  ;;  %s28_s17 = int_to_ptr.hbm [resolvable:$true] %s27_s17 }
   0x4   :  { %18 = vsyncpa [#allocation7], 0  ;;  %s1276_s18 = smov [#allocation4]   ;;  %s42_s22 = sshll.u32 %s2102_s4, 4  ;;  %s43_s22 = int_to_ptr.hbm [resolvable:$true] %s42_s22 }
   0x5   :  { %s29_s19 = sshll.u32 %s1276_s18, 4  ;;  %s1277_s23 = smov 128   ;;  %s30_s19 = int_to_ptr.vmem [resolvable:$true] %s29_s19 }
   0x6   :  { %s1278_s24 = smov 8   ;;  %s1279_s9 = smov [#allocation6]  }
   0x7   :  { %35 = dma.hbm_to_vmem [thread:$0]  %s28_s17, 4224, %s30_s19, [#allocation5], %s1277_s23, %s1277_s23, %s1278_s24  }
   0x8   :  { %s44_s25 = sshll.u32 %s1279_s9, 4  ;;  %s45_s25 = int_to_ptr.vmem [resolvable:$true] %s44_s25 }
   0x9   :  { %50 = dma.hbm_to_vmem [thread:$0]  %s43_s22, 2048, %s45_s25, [#allocation7], %s1277_s23, %s1277_s23, %s1278_s24  }
   0xa   :  { %1272 = dma.done.wait [#allocation5], 4224  }
   0xb   :  { %1273 = vsyncadd [#allocation5], 4294963072 }
   0xc   :  { %1274 = dma.done.wait [#allocation7], 2048  }
   0xd   :  { %1275 = vsyncadd [#allocation7], 4294965248  ;;  %v1280_v1 = vmov 2   ;;  %v1281_v2 = vmov 0   ;;  %v1282_v3 = vmov 4   ;;  %v1283_v5 = vmov 3  }
   0xe   :  { %1143 = vset.pattern.permute.xlu1 %v1280_v1  ;;  %1141 = vset.pattern.permute.xlu0 %v1281_v2  ;;  %v73_v4 = vld [vmem:[%s2098_s0] sm:$0xf]  ;;  %v1284_v6 = vmov 1   ;;  %v1285_v7 = vmov 5   ;;  %v1286_v8 = vmov 6   ;;  %v1287_v9 = vmov 8  }
   0xf   :  { %1145 = vset.pattern.permute.xlu2 %v1282_v3  ;;  %99 = vperm.xlu1 %1143, %v73_v4   ;;  %v1288_v10 = vmov 7   ;;  %v1289_v11 = vmov 9   ;;  %v1290_v12 = vmov 13   ;;  %v1291_v13 = vmov 10   ;;  %v1423_v31 = vld [vmem:[%s2099_s1] sm:$0xf] }
  0x10   :  { %75 = vperm.xlu0 %1141, %v73_v4   ;;  %123 = vperm.xlu2 %1145, %v73_v4   ;;  %v1395_v14 = vadd.s32 132, %v73_v4  ;;  %v1292_v15 = vmov 11   ;;  %v1293_v16 = vmov 18   ;;  %v1294_v17 = vmov 12  }
  0x11   :  { %v1295_v18 = vmov 14   ;;  %v1296_v19 = vmov 23   ;;  %v1297_v20 = vmov 15   ;;  %v1298_v21 = vmov 16  }
  0x12   :  { %v1299_v22 = vmov 17   ;;  %v1300_v23 = vmov 28   ;;  %v1301_v24 = vmov 19   ;;  %v1302_v25 = vmov 20  }
  0x13   :  { %v1303_v26 = vmov 21   ;;  %v1304_v27 = vmov 22   ;;  %v1305_v28 = vmov 33   ;;  %v1306_v29 = vmov 24  }
  0x14   :  { %v1307_v30 = vmov 25   ;;  %v1427_v32 = vadd.s32 67, %v1423_v31  ;;  %v1308_v33 = vmov 26   ;;  %v1309_v34 = vmov 27  }
  0x15   :  { %v1310_v36 = vmov 29   ;;  %v1311_v37 = vmov 30   ;;  %v1312_v39 = vmov 31   ;;  %v69_v40 = vlaneseq }
  0x16   :  { %v1313_v41 = vmov 32   ;;  %v1314_v49 = vmov 0.0  }
  0x17   :  { %1144 = vset.pattern.permute.xlu1 %v1283_v5  ;;  %v1449_v43 = vand.u32 127, %v69_v40 }
  0x18   :  { %1142 = vset.pattern.permute.xlu0 %v1284_v6  ;;  %111 = vperm.xlu1 %1144, %v73_v4  }
  0x19   :  { %87 = vperm.xlu0 %1142, %v73_v4   ;;  %1146 = vset.pattern.permute.xlu2 %v1285_v7  ;;  %v1453_v46 = vadd.s32 128, %v1449_v43  ;;  %v1457_v47 = vadd.s32 256, %v1449_v43 }
  0x1a   :  { %135 = vperm.xlu2 %1146, %v73_v4  }
  0x20   :  { %1147 = vset.pattern.permute.xlu1 %v1286_v8 }
  0x21   :  { %1149 = vset.pattern.permute.xlu0 %v1287_v9  ;;  %147 = vperm.xlu1 %1147, %v73_v4  }
  0x22   :  { %171 = vperm.xlu0 %1149, %v73_v4   ;;  %1148 = vset.pattern.permute.xlu2 %v1288_v10 }
  0x23   :  { %159 = vperm.xlu2 %1148, %v73_v4  }
  0x29   :  { %1150 = vset.pattern.permute.xlu1 %v1289_v11 }
  0x2a   :  { %1154 = vset.pattern.permute.xlu0 %v1290_v12  ;;  %183 = vperm.xlu1 %1150, %v73_v4  }
  0x2b   :  { %231 = vperm.xlu0 %1154, %v73_v4   ;;  %1151 = vset.pattern.permute.xlu2 %v1291_v13 }
  0x2c   :  { %195 = vperm.xlu2 %1151, %v73_v4  }
  0x32   :  { %1152 = vset.pattern.permute.xlu1 %v1292_v15 }
  0x33   :  { %1159 = vset.pattern.permute.xlu0 %v1293_v16  ;;  %207 = vperm.xlu1 %1152, %v73_v4  }
  0x34   :  { %292 = vperm.xlu0 %1159, %v1395_v14   ;;  %1153 = vset.pattern.permute.xlu2 %v1294_v17 }
  0x35   :  { %219 = vperm.xlu2 %1153, %v73_v4  }
  0x3b   :  { %1155 = vset.pattern.permute.xlu1 %v1295_v18 }
  0x3c   :  { %1164 = vset.pattern.permute.xlu0 %v1296_v19  ;;  %243 = vperm.xlu1 %1155, %v73_v4  }
  0x3d   :  { %352 = vperm.xlu0 %1164, %v1395_v14   ;;  %1156 = vset.pattern.permute.xlu2 %v1297_v20 }
  0x3e   :  { %255 = vperm.xlu2 %1156, %v73_v4  }
  0x44   :  { %1157 = vset.pattern.permute.xlu1 %v1298_v21 }
  0x45   :  { %267 = vperm.xlu1 %1157, %v73_v4   ;;  %1169 = vset.pattern.permute.xlu0 %v1300_v23 }
  0x46   :  { %1158 = vset.pattern.permute.xlu2 %v1299_v22  ;;  %412 = vperm.xlu0 %1169, %v1395_v14  }
  0x47   :  { %280 = vperm.xlu2 %1158, %v1395_v14  }
  0x4d   :  { %1160 = vset.pattern.permute.xlu1 %v1301_v24 }
  0x4e   :  { %304 = vperm.xlu1 %1160, %v1395_v14   ;;  %1174 = vset.pattern.permute.xlu0 %v1305_v28 }
  0x4f   :  { %1161 = vset.pattern.permute.xlu2 %v1302_v25  ;;  %472 = vperm.xlu0 %1174, %v1395_v14  }
  0x50   :  { %316 = vperm.xlu2 %1161, %v1395_v14  }
  0x56   :  { %1162 = vset.pattern.permute.xlu1 %v1303_v26 }
  0x57   :  { %328 = vperm.xlu1 %1162, %v1395_v14   ;;  %1179 = vset.pattern.permute.xlu0 %v1282_v3 }
  0x58   :  { %1163 = vset.pattern.permute.xlu2 %v1304_v27  ;;  %534 = vperm.xlu0 %1179, %v1427_v32  }
  0x59   :  { %340 = vperm.xlu2 %1163, %v1395_v14  }
  0x5f   :  { %1165 = vset.pattern.permute.xlu1 %v1306_v29 }
  0x60   :  { %364 = vperm.xlu1 %1165, %v1395_v14   ;;  %1184 = vset.pattern.permute.xlu0 %v1289_v11 }
  0x61   :  { %1166 = vset.pattern.permute.xlu2 %v1307_v30  ;;  %594 = vperm.xlu0 %1184, %v1427_v32  }
  0x62   :  { %376 = vperm.xlu2 %1166, %v1395_v14  }
  0x68   :  { %1167 = vset.pattern.permute.xlu1 %v1308_v33 }
  0x69   :  { %388 = vperm.xlu1 %1167, %v1395_v14   ;;  %1189 = vset.pattern.permute.xlu0 %v1295_v18 }
  0x6a   :  { %1168 = vset.pattern.permute.xlu2 %v1309_v34  ;;  %v124_v35 = vpop.permute.xlu2 %123  ;;  %654 = vperm.xlu0 %1189, %v1427_v32  }
  0x6b   :  { %400 = vperm.xlu2 %1168, %v1395_v14   ;;  %vm125_vm0 = vcmp.eq.s32.totalorder %v124_v35, %v1449_v43  ;;  %vm126_vm1 = vcmp.eq.s32.totalorder %v124_v35, %v1453_v46  ;;  %vm127_vm2 = vcmp.eq.s32.totalorder %v124_v35, %v1457_v47 }
  0x6c   :  { %v128_v50 = vsel %vm125_vm0, 1.0, %v1314_v49  ;;  %v129_v51 = vsel %vm126_vm1, 1.0, %v1314_v49  ;;  %v130_v52 = vsel %vm127_vm2, 1.0, %v1314_v49 }
  0x71   :  { %1170 = vset.pattern.permute.xlu1 %v1310_v36 }
  0x72   :  { %424 = vperm.xlu1 %1170, %v1395_v14   ;;  %1194 = vset.pattern.permute.xlu0 %v1301_v24 }
  0x73   :  { %1171 = vset.pattern.permute.xlu2 %v1311_v37 }
  0x74   :  { %v1440_v38 = vpop.permute.xlu2 %135  ;;  %436 = vperm.xlu2 %1171, %v1395_v14  }
  0x75   :  { %vm137_vm3 = vcmp.eq.s32.totalorder %v1440_v38, %v1449_v43  ;;  %vm138_vm7 = vcmp.eq.s32.totalorder %v1440_v38, %v1453_v46  ;;  %vm139_vm8 = vcmp.eq.s32.totalorder %v1440_v38, %v1457_v47 }
  0x76   :  { %v140_v55 = vsel %vm137_vm3, 1.0, %v1314_v49  ;;  %v141_v24 = vsel %vm138_vm7, 1.0, %v1314_v49 }
  0x7a   :  { %1172 = vset.pattern.permute.xlu1 %v1312_v39 }
  0x7b   :  { %448 = vperm.xlu1 %1172, %v1395_v14  }
  0x7c   :  { %1173 = vset.pattern.permute.xlu2 %v1313_v41  ;;  %v142_v41 = vsel %vm139_vm8, 1.0, %v1314_v49 }
  0x7d   :  { %v1446_v42 = vpop.permute.xlu2 %159  ;;  %460 = vperm.xlu2 %1173, %v1395_v14  }
  0x7e   :  { %vm161_vm2 = vcmp.eq.s32.totalorder %v1446_v42, %v1449_v43  ;;  %vm162_vm3 = vcmp.eq.s32.totalorder %v1446_v42, %v1453_v46 }
  0x81   :  { %v100_v44 = vpop.permute.xlu1 %99 }
  0x82   :  { %v76_v45 = vpop.permute.xlu0 %75  ;;  %vm101_vm9 = vcmp.eq.s32.totalorder %v100_v44, %v1449_v43  ;;  %vm102_vm11 = vcmp.eq.s32.totalorder %v100_v44, %v1453_v46  ;;  %vm103_vm12 = vcmp.eq.s32.totalorder %v100_v44, %v1457_v47 }
  0x83   :  { %1175 = vset.pattern.permute.xlu1 %v1281_v2  ;;  %vm77_vm4 = vcmp.eq.s32.totalorder %v76_v45, %v1449_v43  ;;  %vm78_vm5 = vcmp.eq.s32.totalorder %v76_v45, %v1453_v46  ;;  %vm79_vm6 = vcmp.eq.s32.totalorder %v76_v45, %v1457_v47  ;;  %v104_v0 = vsel %vm101_vm9, 1.0, %v1314_v49 }
  0x84   :  { %486 = vperm.xlu1 %1175, %v1427_v32   ;;  %v80_v56 = vsel %vm77_vm4, 1.0, %v1314_v49  ;;  %v81_v57 = vsel %vm78_vm5, 1.0, %v1314_v49  ;;  %v82_v58 = vsel %vm79_vm6, 1.0, %v1314_v49  ;;  %v106_v4 = vsel %vm103_vm12, 1.0, %v1314_v49 }
  0x85   :  { %1176 = vset.pattern.permute.xlu2 %v1284_v6  ;;  %vm163_vm4 = vcmp.eq.s32.totalorder %v1446_v42, %v1457_v47 }
  0x86   :  { %v1462_v48 = vpop.permute.xlu2 %195  ;;  %498 = vperm.xlu2 %1176, %v1427_v32  }
  0x87   :  { %vm198_vm12 = vcmp.eq.s32.totalorder %v1462_v48, %v1453_v46 }
  0x8a   :  { %v112_v53 = vpop.permute.xlu1 %111 }
  0x8b   :  { %v88_v54 = vpop.permute.xlu0 %87  ;;  %vm113_vm14 = vcmp.eq.s32.totalorder %v112_v53, %v1449_v43  ;;  %vm114_vm0 = vcmp.eq.s32.totalorder %v112_v53, %v1453_v46  ;;  %vm115_vm1 = vcmp.eq.s32.totalorder %v112_v53, %v1457_v47  ;;  %v164_v53 = vsel %vm161_vm2, 1.0, %v1314_v49 }
  0x8c   :  { %vm89_vm10 = vcmp.eq.s32.totalorder %v88_v54, %v1449_v43  ;;  %vm90_vm13 = vcmp.eq.s32.totalorder %v88_v54, %v1453_v46  ;;  %1177 = vset.pattern.permute.xlu1 %v1280_v1  ;;  %vm91_vm15 = vcmp.eq.s32.totalorder %v88_v54, %v1457_v47  ;;  %v105_v1 = vsel %vm102_vm11, 1.0, %v1314_v49 }
  0x8d   :  { %v92_v59 = vsel %vm89_vm10, 1.0, %v1314_v49  ;;  %v93_v60 = vsel %vm90_vm13, 1.0, %v1314_v49  ;;  %510 = vperm.xlu1 %1177, %v1427_v32   ;;  %v94_v61 = vsel %vm91_vm15, 1.0, %v1314_v49  ;;  %v116_v11 = vsel %vm113_vm14, 1.0, %v1314_v49 }
  0x8e   :  { %v95_v62 = vadd.f32 %v92_v59, %v80_v56  ;;  %v96_v63 = vadd.f32 %v93_v60, %v81_v57  ;;  %1178 = vset.pattern.permute.xlu2 %v1283_v5  ;;  %v97_v2 = vadd.f32 %v94_v61, %v82_v58  ;;  %v117_v14 = vsel %vm114_vm0, 1.0, %v1314_v49 }
  0x8f   :  { %v1505_v3 = vpop.permute.xlu2 %219  ;;  %522 = vperm.xlu2 %1178, %v1427_v32   ;;  %v118_v28 = vsel %vm115_vm1, 1.0, %v1314_v49  ;;  %vm197_vm11 = vcmp.eq.s32.totalorder %v1462_v48, %v1449_v43  ;;  %vm199_vm13 = vcmp.eq.s32.totalorder %v1462_v48, %v1457_v47 }
  0x90   :  { %v107_v5 = vadd.f32 %v104_v0, %v95_v62  ;;  %v108_v6 = vadd.f32 %v105_v1, %v96_v63  ;;  %v109_v18 = vadd.f32 %v106_v4, %v97_v2 }
  0x92   :  { %v119_v35 = vadd.f32 %v116_v11, %v107_v5  ;;  %v120_v40 = vadd.f32 %v117_v14, %v108_v6  ;;  %v121_v44 = vadd.f32 %v118_v28, %v109_v18  ;;  %v200_v18 = vsel %vm197_vm11, 1.0, %v1314_v49 }
  0x93   :  { %v148_v45 = vpop.permute.xlu1 %147 }
  0x94   :  { %v172_v54 = vpop.permute.xlu0 %171  ;;  %v131_v56 = vadd.f32 %v128_v50, %v119_v35  ;;  %v132_v57 = vadd.f32 %v129_v51, %v120_v40  ;;  %vm149_vm5 = vcmp.eq.s32.totalorder %v148_v45, %v1449_v43  ;;  %vm150_vm6 = vcmp.eq.s32.totalorder %v148_v45, %v1453_v46 }
  0x95   :  { %v133_v58 = vadd.f32 %v130_v52, %v121_v44  ;;  %vm151_vm7 = vcmp.eq.s32.totalorder %v148_v45, %v1457_v47  ;;  %v152_v38 = vsel %vm149_vm5, 1.0, %v1314_v49  ;;  %v153_v59 = vsel %vm150_vm6, 1.0, %v1314_v49  ;;  %1180 = vset.pattern.permute.xlu1 %v1285_v7 }
  0x96   :  { %v143_v60 = vadd.f32 %v140_v55, %v131_v56  ;;  %v144_v61 = vadd.f32 %v141_v24, %v132_v57  ;;  %v154_v62 = vsel %vm151_vm7, 1.0, %v1314_v49  ;;  %546 = vperm.xlu1 %1180, %v1427_v32   ;;  %vm173_vm8 = vcmp.eq.s32.totalorder %v172_v54, %v1449_v43 }
  0x97   :  { %v145_v50 = vadd.f32 %v142_v41, %v133_v58  ;;  %v165_v51 = vsel %vm162_vm3, 1.0, %v1314_v49  ;;  %vm174_vm9 = vcmp.eq.s32.totalorder %v172_v54, %v1453_v46  ;;  %vm175_vm10 = vcmp.eq.s32.totalorder %v172_v54, %v1457_v47  ;;  %1181 = vset.pattern.permute.xlu2 %v1286_v8 }
  0x98   :  { %v155_v7 = vadd.f32 %v152_v38, %v143_v60  ;;  %v156_v52 = vadd.f32 %v153_v59, %v144_v61  ;;  %v166_v55 = vsel %vm163_vm4, 1.0, %v1314_v49  ;;  %v1555_v63 = vpop.permute.xlu2 %255  ;;  %558 = vperm.xlu2 %1181, %v1427_v32   ;;  %v176_v1 = vsel %vm173_vm8, 1.0, %v1314_v49 }
  0x99   :  { %v157_v0 = vadd.f32 %v154_v62, %v145_v50  ;;  %v177_v2 = vsel %vm174_vm9, 1.0, %v1314_v49  ;;  %v178_v42 = vsel %vm175_vm10, 1.0, %v1314_v49  ;;  %v201_v24 = vsel %vm198_vm12, 1.0, %v1314_v49 }
  0x9a   :  { %v167_v8 = vadd.f32 %v164_v53, %v155_v7  ;;  %v168_v4 = vadd.f32 %v165_v51, %v156_v52  ;;  %v202_v41 = vsel %vm199_vm13, 1.0, %v1314_v49  ;;  %v1581_v38 = vadd.s32 199, %v1423_v31 }
  0x9b   :  { %v169_v5 = vadd.f32 %v166_v55, %v157_v0  ;;  %vm221_vm4 = vcmp.eq.s32.totalorder %v1505_v3, %v1449_v43  ;;  %vm222_vm5 = vcmp.eq.s32.totalorder %v1505_v3, %v1453_v46  ;;  %vm223_vm6 = vcmp.eq.s32.totalorder %v1505_v3, %v1457_v47 }
  0x9c   :  { %v179_v6 = vadd.f32 %v176_v1, %v167_v8  ;;  %v180_v11 = vadd.f32 %v177_v2, %v168_v4  ;;  %v184_v14 = vpop.permute.xlu1 %183  ;;  %715 = vperm.xlu0 %1194, %v1581_v38   ;;  %v225_v50 = vsel %vm222_vm5, 1.0, %v1314_v49  ;;  %v226_v51 = vsel %vm223_vm6, 1.0, %v1314_v49 }
  0x9d   :  { %v181_v28 = vadd.f32 %v178_v42, %v169_v5  ;;  %vm185_vm14 = vcmp.eq.s32.totalorder %v184_v14, %v1449_v43  ;;  %vm186_vm15 = vcmp.eq.s32.totalorder %v184_v14, %v1453_v46  ;;  %vm187_vm0 = vcmp.eq.s32.totalorder %v184_v14, %v1457_v47  ;;  %v232_v31 = vpop.permute.xlu0 %231 }
  0x9e   :  { %v188_v35 = vsel %vm185_vm14, 1.0, %v1314_v49  ;;  %v189_v40 = vsel %vm186_vm15, 1.0, %v1314_v49  ;;  %v190_v48 = vsel %vm187_vm0, 1.0, %v1314_v49  ;;  %1182 = vset.pattern.permute.xlu1 %v1288_v10  ;;  %vm233_vm7 = vcmp.eq.s32.totalorder %v232_v31, %v1449_v43 }
  0x9f   :  { %v191_v44 = vadd.f32 %v188_v35, %v179_v6  ;;  %v192_v45 = vadd.f32 %v189_v40, %v180_v11  ;;  %v193_v53 = vadd.f32 %v190_v48, %v181_v28  ;;  %570 = vperm.xlu1 %1182, %v1427_v32   ;;  %vm234_vm8 = vcmp.eq.s32.totalorder %v232_v31, %v1453_v46 }
  0xa0   :  { %1183 = vset.pattern.permute.xlu2 %v1287_v9  ;;  %vm235_vm9 = vcmp.eq.s32.totalorder %v232_v31, %v1457_v47  ;;  %vm257_vm13 = vcmp.eq.s32.totalorder %v1555_v63, %v1449_v43  ;;  %vm258_vm14 = vcmp.eq.s32.totalorder %v1555_v63, %v1453_v46  ;;  %vm259_vm15 = vcmp.eq.s32.totalorder %v1555_v63, %v1457_v47 }
  0xa1   :  { %v203_v54 = vadd.f32 %v200_v18, %v191_v44  ;;  %v204_v56 = vadd.f32 %v201_v24, %v192_v45  ;;  %v205_v57 = vadd.f32 %v202_v41, %v193_v53  ;;  %582 = vperm.xlu2 %1183, %v1427_v32   ;;  %v1578_v58 = vpop.permute.xlu2 %280  ;;  %v238_v55 = vsel %vm235_vm9, 1.0, %v1314_v49 }
  0xa2   :  { %v260_v11 = vsel %vm257_vm13, 1.0, %v1314_v49  ;;  %v262_v63 = vsel %vm259_vm15, 1.0, %v1314_v49  ;;  %vm284_vm5 = vcmp.eq.s32.totalorder %v1578_v58, %v1457_v47 }
  0xa4   :  { %1199 = vset.pattern.permute.xlu0 %v1306_v29 }
  0xa5   :  { %v208_v59 = vpop.permute.xlu1 %207  ;;  %775 = vperm.xlu0 %1199, %v1581_v38  }
  0xa6   :  { %vm209_vm1 = vcmp.eq.s32.totalorder %v208_v59, %v1449_v43  ;;  %vm210_vm2 = vcmp.eq.s32.totalorder %v208_v59, %v1453_v46  ;;  %vm211_vm3 = vcmp.eq.s32.totalorder %v208_v59, %v1457_v47  ;;  %v293_v48 = vpop.permute.xlu0 %292 }
  0xa7   :  { %1185 = vset.pattern.permute.xlu1 %v1291_v13  ;;  %v214_v29 = vsel %vm211_vm3, 1.0, %v1314_v49  ;;  %vm282_vm3 = vcmp.eq.s32.totalorder %v1578_v58, %v1449_v43  ;;  %vm294_vm6 = vcmp.eq.s32.totalorder %v293_v48, %v1449_v43 }
  0xa8   :  { %606 = vperm.xlu1 %1185, %v1427_v32   ;;  %v217_v62 = vadd.f32 %v214_v29, %v205_v57 }
  0xa9   :  { %1186 = vset.pattern.permute.xlu2 %v1292_v15  ;;  %v212_v15 = vsel %vm209_vm1, 1.0, %v1314_v49 }
  0xaa   :  { %618 = vperm.xlu2 %1186, %v1427_v32   ;;  %v1588_v9 = vpop.permute.xlu2 %316  ;;  %v215_v60 = vadd.f32 %v212_v15, %v203_v54  ;;  %v229_v52 = vadd.f32 %v226_v51, %v217_v62  ;;  %v285_v54 = vsel %vm282_vm3, 1.0, %v1314_v49 }
  0xab   :  { %vm319_vm13 = vcmp.eq.s32.totalorder %v1588_v9, %v1453_v46 }
  0xac   :  { %v241_v5 = vadd.f32 %v238_v55, %v229_v52 }
  0xad   :  { %1204 = vset.pattern.permute.xlu0 %v1310_v36  ;;  %v224_v36 = vsel %vm221_vm4, 1.0, %v1314_v49  ;;  %vm283_vm4 = vcmp.eq.s32.totalorder %v1578_v58, %v1453_v46  ;;  %v297_v58 = vsel %vm294_vm6, 1.0, %v1314_v49 }
  0xae   :  { %v244_v10 = vpop.permute.xlu1 %243  ;;  %835 = vperm.xlu0 %1204, %v1581_v38   ;;  %v227_v3 = vadd.f32 %v224_v36, %v215_v60  ;;  %v286_v59 = vsel %vm283_vm4, 1.0, %v1314_v49 }
  0xaf   :  { %vm245_vm10 = vcmp.eq.s32.totalorder %v244_v10, %v1449_v43  ;;  %vm246_vm11 = vcmp.eq.s32.totalorder %v244_v10, %v1453_v46  ;;  %vm247_vm12 = vcmp.eq.s32.totalorder %v244_v10, %v1457_v47  ;;  %v287_v10 = vsel %vm284_vm5, 1.0, %v1314_v49 }
  0xb0   :  { %1187 = vset.pattern.permute.xlu1 %v1294_v17  ;;  %v248_v0 = vsel %vm245_vm10, 1.0, %v1314_v49  ;;  %v249_v8 = vsel %vm246_vm11, 1.0, %v1314_v49  ;;  %v250_v4 = vsel %vm247_vm12, 1.0, %v1314_v49  ;;  %vm318_vm12 = vcmp.eq.s32.totalorder %v1588_v9, %v1449_v43 }
  0xb1   :  { %630 = vperm.xlu1 %1187, %v1427_v32   ;;  %v253_v18 = vadd.f32 %v250_v4, %v241_v5 }
  0xb2   :  { %1188 = vset.pattern.permute.xlu2 %v1290_v12  ;;  %v213_v12 = vsel %vm210_vm2, 1.0, %v1314_v49 }
  0xb3   :  { %642 = vperm.xlu2 %1188, %v1427_v32   ;;  %v1597_v13 = vpop.permute.xlu2 %340  ;;  %v216_v61 = vadd.f32 %v213_v12, %v204_v56  ;;  %v265_v44 = vadd.f32 %v262_v63, %v253_v18 }
  0xb4   :  { %vm343_vm3 = vcmp.eq.s32.totalorder %v1597_v13, %v1453_v46  ;;  %vm344_vm4 = vcmp.eq.s32.totalorder %v1597_v13, %v1457_v47 }
  0xb5   :  { %v346_v18 = vsel %vm343_vm3, 1.0, %v1314_v49 }
  0xb6   :  { %1207 = vset.pattern.permute.xlu0 %v1312_v39 }
  0xb7   :  { %v268_v17 = vpop.permute.xlu1 %267 }
  0xb8   :  { %vm269_vm0 = vcmp.eq.s32.totalorder %v268_v17, %v1449_v43  ;;  %vm270_vm1 = vcmp.eq.s32.totalorder %v268_v17, %v1453_v46  ;;  %vm271_vm2 = vcmp.eq.s32.totalorder %v268_v17, %v1457_v47 }
  0xb9   :  { %1190 = vset.pattern.permute.xlu1 %v1297_v20  ;;  %v236_v20 = vsel %vm233_vm7, 1.0, %v1314_v49  ;;  %v272_v24 = vsel %vm269_vm0, 1.0, %v1314_v49  ;;  %v274_v40 = vsel %vm271_vm2, 1.0, %v1314_v49  ;;  %vm295_vm7 = vcmp.eq.s32.totalorder %v293_v48, %v1453_v46 }
  0xba   :  { %666 = vperm.xlu1 %1190, %v1427_v32   ;;  %v228_v32 = vadd.f32 %v225_v50, %v216_v61  ;;  %v239_v2 = vadd.f32 %v236_v20, %v227_v3  ;;  %v277_v57 = vadd.f32 %v274_v40, %v265_v44  ;;  %v298_v12 = vsel %vm295_vm7, 1.0, %v1314_v49 }
  0xbb   :  { %1191 = vset.pattern.permute.xlu2 %v1298_v21  ;;  %v237_v21 = vsel %vm234_vm8, 1.0, %v1314_v49  ;;  %vm296_vm8 = vcmp.eq.s32.totalorder %v293_v48, %v1457_v47  ;;  %v321_v20 = vsel %vm318_vm12, 1.0, %v1314_v49  ;;  %vm342_vm2 = vcmp.eq.s32.totalorder %v1597_v13, %v1449_v43 }
  0xbc   :  { %679 = vperm.xlu2 %1191, %v1581_v38   ;;  %v1620_v7 = vpop.permute.xlu2 %376  ;;  %v240_v42 = vadd.f32 %v237_v21, %v228_v32  ;;  %v251_v6 = vadd.f32 %v248_v0, %v239_v2  ;;  %v290_v17 = vadd.f32 %v287_v10, %v277_v57  ;;  %v299_v29 = vsel %vm296_vm8, 1.0, %v1314_v49  ;;  %v353_v2 = vpop.permute.xlu0 %352 }
  0xbd   :  { %vm354_vm5 = vcmp.eq.s32.totalorder %v353_v2, %v1449_v43  ;;  %vm355_vm6 = vcmp.eq.s32.totalorder %v353_v2, %v1453_v46  ;;  %vm356_vm7 = vcmp.eq.s32.totalorder %v353_v2, %v1457_v47  ;;  %vm379_vm12 = vcmp.eq.s32.totalorder %v1620_v7, %v1453_v46 }
  0xbe   :  { %v252_v14 = vadd.f32 %v249_v8, %v240_v42  ;;  %v263_v35 = vadd.f32 %v260_v11, %v251_v6  ;;  %v302_v51 = vadd.f32 %v299_v29, %v290_v17  ;;  %v357_v13 = vsel %vm354_vm5, 1.0, %v1314_v49 }
  0xbf   :  { %v359_v40 = vsel %vm356_vm7, 1.0, %v1314_v49 }
  0xc0   :  { %v305_v1 = vpop.permute.xlu1 %304  ;;  %v275_v45 = vadd.f32 %v272_v24, %v263_v35 }
  0xc1   :  { %vm306_vm9 = vcmp.eq.s32.totalorder %v305_v1, %v1449_v43  ;;  %vm307_vm10 = vcmp.eq.s32.totalorder %v305_v1, %v1453_v46  ;;  %vm308_vm11 = vcmp.eq.s32.totalorder %v305_v1, %v1457_v47 }
  0xc2   :  { %1192 = vset.pattern.permute.xlu1 %v1299_v22  ;;  %v261_v22 = vsel %vm258_vm14, 1.0, %v1314_v49  ;;  %v288_v15 = vadd.f32 %v285_v54, %v275_v45  ;;  %v309_v31 = vsel %vm306_vm9, 1.0, %v1314_v49  ;;  %v311_v61 = vsel %vm308_vm11, 1.0, %v1314_v49 }
  0xc3   :  { %691 = vperm.xlu1 %1192, %v1581_v38   ;;  %v264_v41 = vadd.f32 %v261_v22, %v252_v14  ;;  %vm320_vm14 = vcmp.eq.s32.totalorder %v1588_v9, %v1457_v47  ;;  %v314_v52 = vadd.f32 %v311_v61, %v302_v51  ;;  %v322_v9 = vsel %vm319_vm13, 1.0, %v1314_v49 }
  0xc4   :  { %1193 = vset.pattern.permute.xlu2 %v1293_v16  ;;  %v273_v16 = vsel %vm270_vm1, 1.0, %v1314_v49  ;;  %v300_v36 = vadd.f32 %v297_v58, %v288_v15  ;;  %v323_v21 = vsel %vm320_vm14, 1.0, %v1314_v49  ;;  %v347_v22 = vsel %vm344_vm4, 1.0, %v1314_v49  ;;  %v413_v29 = vpop.permute.xlu0 %412 }
  0xc5   :  { %703 = vperm.xlu2 %1193, %v1581_v38   ;;  %v1651_v28 = vpop.permute.xlu2 %400  ;;  %v276_v56 = vadd.f32 %v273_v16, %v264_v41  ;;  %v326_v4 = vadd.f32 %v323_v21, %v314_v52  ;;  %v358_v16 = vsel %vm355_vm6, 1.0, %v1314_v49  ;;  %vm378_vm11 = vcmp.eq.s32.totalorder %v1620_v7, %v1449_v43 }
  0xc6   :  { %v312_v3 = vadd.f32 %v309_v31, %v300_v36  ;;  %vm380_vm13 = vcmp.eq.s32.totalorder %v1620_v7, %v1457_v47  ;;  %v381_v54 = vsel %vm378_vm11, 1.0, %v1314_v49  ;;  %v382_v15 = vsel %vm379_vm12, 1.0, %v1314_v49 }
  0xc7   :  { %v383_v7 = vsel %vm380_vm13, 1.0, %v1314_v49  ;;  %vm404_vm3 = vcmp.eq.s32.totalorder %v1651_v28, %v1457_v47  ;;  %vm414_vm4 = vcmp.eq.s32.totalorder %v413_v29, %v1449_v43  ;;  %vm415_vm5 = vcmp.eq.s32.totalorder %v413_v29, %v1453_v46 }
  0xc8   :  { %v324_v0 = vadd.f32 %v321_v20, %v312_v3  ;;  %v407_v51 = vsel %vm404_vm3, 1.0, %v1314_v49  ;;  %vm416_vm6 = vcmp.eq.s32.totalorder %v413_v29, %v1457_v47 }
  0xc9   :  { %v329_v53 = vpop.permute.xlu1 %328  ;;  %v419_v21 = vsel %vm416_vm6, 1.0, %v1314_v49 }
  0xca   :  { %vm330_vm15 = vcmp.eq.s32.totalorder %v329_v53, %v1449_v43  ;;  %vm331_vm0 = vcmp.eq.s32.totalorder %v329_v53, %v1453_v46  ;;  %vm332_vm1 = vcmp.eq.s32.totalorder %v329_v53, %v1457_v47 }
  0xcb   :  { %1195 = vset.pattern.permute.xlu1 %v1302_v25  ;;  %v289_v25 = vadd.f32 %v286_v59, %v276_v56  ;;  %v333_v55 = vsel %vm330_vm15, 1.0, %v1314_v49  ;;  %v335_v1 = vsel %vm332_vm1, 1.0, %v1314_v49  ;;  %vm402_vm1 = vcmp.eq.s32.totalorder %v1651_v28, %v1449_v43 }
  0xcc   :  { %727 = vperm.xlu1 %1195, %v1581_v38   ;;  %v336_v42 = vadd.f32 %v333_v55, %v324_v0  ;;  %v338_v11 = vadd.f32 %v335_v1, %v326_v4 }
  0xcd   :  { %1196 = vset.pattern.permute.xlu2 %v1303_v26  ;;  %v310_v26 = vsel %vm307_vm10, 1.0, %v1314_v49  ;;  %v301_v50 = vadd.f32 %v298_v12, %v289_v25 }
  0xce   :  { %739 = vperm.xlu2 %1196, %v1581_v38   ;;  %v1678_v60 = vpop.permute.xlu2 %436  ;;  %v350_v35 = vadd.f32 %v347_v22, %v338_v11  ;;  %v473_v22 = vpop.permute.xlu0 %472 }
  0xcf   :  { %v313_v32 = vadd.f32 %v310_v26, %v301_v50  ;;  %vm439_vm11 = vcmp.eq.s32.totalorder %v1678_v60, %v1453_v46  ;;  %vm440_vm12 = vcmp.eq.s32.totalorder %v1678_v60, %v1457_v47  ;;  %vm474_vm3 = vcmp.eq.s32.totalorder %v473_v22, %v1449_v43 }
  0xd0   :  { %v362_v45 = vadd.f32 %v359_v40, %v350_v35 }
  0xd1   :  { %v325_v8 = vadd.f32 %v322_v9, %v313_v32  ;;  %v418_v9 = vsel %vm415_vm5, 1.0, %v1314_v49  ;;  %vm476_vm5 = vcmp.eq.s32.totalorder %v473_v22, %v1457_v47 }
  0xd2   :  { %v365_v62 = vpop.permute.xlu1 %364 }
  0xd3   :  { %vm366_vm8 = vcmp.eq.s32.totalorder %v365_v62, %v1449_v43  ;;  %vm367_vm9 = vcmp.eq.s32.totalorder %v365_v62, %v1453_v46  ;;  %vm368_vm10 = vcmp.eq.s32.totalorder %v365_v62, %v1457_v47 }
  0xd4   :  { %1197 = vset.pattern.permute.xlu1 %v1304_v27  ;;  %v334_v27 = vsel %vm331_vm0, 1.0, %v1314_v49  ;;  %v369_v48 = vsel %vm366_vm8, 1.0, %v1314_v49  ;;  %v370_v41 = vsel %vm367_vm9, 1.0, %v1314_v49  ;;  %v371_v44 = vsel %vm368_vm10, 1.0, %v1314_v49 }
  0xd5   :  { %751 = vperm.xlu1 %1197, %v1581_v38   ;;  %v337_v6 = vadd.f32 %v334_v27, %v325_v8  ;;  %v374_v10 = vadd.f32 %v371_v44, %v362_v45  ;;  %vm438_vm10 = vcmp.eq.s32.totalorder %v1678_v60, %v1449_v43 }
  0xd6   :  { %1198 = vset.pattern.permute.xlu2 %v1296_v19  ;;  %v345_v19 = vsel %vm342_vm2, 1.0, %v1314_v49  ;;  %vm403_vm2 = vcmp.eq.s32.totalorder %v1651_v28, %v1453_v46  ;;  %v417_v28 = vsel %vm414_vm4, 1.0, %v1314_v49  ;;  %v441_v4 = vsel %vm438_vm10, 1.0, %v1314_v49 }
  0xd7   :  { %763 = vperm.xlu2 %1198, %v1581_v38   ;;  %v1708_v5 = vpop.permute.xlu2 %460  ;;  %v348_v63 = vadd.f32 %v345_v19, %v336_v42  ;;  %v349_v24 = vadd.f32 %v346_v18, %v337_v6  ;;  %v386_v36 = vadd.f32 %v383_v7, %v374_v10  ;;  %v406_v50 = vsel %vm403_vm2, 1.0, %v1314_v49 }
  0xd8   :  { %v442_v19 = vsel %vm439_vm11, 1.0, %v1314_v49  ;;  %v443_v6 = vsel %vm440_vm12, 1.0, %v1314_v49  ;;  %vm464_vm2 = vcmp.eq.s32.totalorder %v1708_v5, %v1457_v47  ;;  %vm475_vm4 = vcmp.eq.s32.totalorder %v473_v22, %v1453_v46 }
  0xdb   :  { %v389_v14 = vpop.permute.xlu1 %388 }
  0xdc   :  { %vm390_vm14 = vcmp.eq.s32.totalorder %v389_v14, %v1449_v43  ;;  %vm391_vm15 = vcmp.eq.s32.totalorder %v389_v14, %v1453_v46  ;;  %vm392_vm0 = vcmp.eq.s32.totalorder %v389_v14, %v1457_v47 }
  0xdd   :  { %1200 = vset.pattern.permute.xlu1 %v1307_v30  ;;  %v360_v30 = vadd.f32 %v357_v13, %v348_v63  ;;  %v393_v58 = vsel %vm390_vm14, 1.0, %v1314_v49  ;;  %v394_v17 = vsel %vm391_vm15, 1.0, %v1314_v49  ;;  %v395_v12 = vsel %vm392_vm0, 1.0, %v1314_v49 }
  0xde   :  { %787 = vperm.xlu1 %1200, %v1581_v38   ;;  %v398_v62 = vadd.f32 %v395_v12, %v386_v36  ;;  %vm462_vm0 = vcmp.eq.s32.totalorder %v1708_v5, %v1449_v43 }
  0xdf   :  { %1201 = vset.pattern.permute.xlu2 %v1308_v33  ;;  %v361_v33 = vadd.f32 %v358_v16, %v349_v24  ;;  %v372_v53 = vadd.f32 %v369_v48, %v360_v30  ;;  %v465_v16 = vsel %vm462_vm0, 1.0, %v1314_v49 }
  0xe0   :  { %799 = vperm.xlu2 %1201, %v1581_v38   ;;  %v1736_v57 = vpop.permute.xlu2 %498  ;;  %v410_v52 = vadd.f32 %v407_v51, %v398_v62  ;;  %v535_v51 = vpop.permute.xlu0 %534 }
  0xe1   :  { %v373_v59 = vadd.f32 %v370_v41, %v361_v33  ;;  %v384_v25 = vadd.f32 %v381_v54, %v372_v53  ;;  %v467_v41 = vsel %vm464_vm2, 1.0, %v1314_v49  ;;  %v477_v33 = vsel %vm474_vm3, 1.0, %v1314_v49 }
  0xe2   :  { %v422_v2 = vadd.f32 %v419_v21, %v410_v52  ;;  %v478_v54 = vsel %vm475_vm4, 1.0, %v1314_v49  ;;  %vm501_vm10 = vcmp.eq.s32.totalorder %v1736_v57, %v1453_v46  ;;  %vm502_vm11 = vcmp.eq.s32.totalorder %v1736_v57, %v1457_v47 }
  0xe3   :  { %v385_v31 = vadd.f32 %v382_v15, %v373_v59  ;;  %v396_v26 = vadd.f32 %v393_v58, %v384_v25  ;;  %vm536_vm2 = vcmp.eq.s32.totalorder %v535_v51, %v1449_v43  ;;  %vm537_vm3 = vcmp.eq.s32.totalorder %v535_v51, %v1453_v46 }
  0xe4   :  { %v425_v56 = vpop.permute.xlu1 %424  ;;  %vm538_vm4 = vcmp.eq.s32.totalorder %v535_v51, %v1457_v47 }
  0xe5   :  { %v397_v61 = vadd.f32 %v394_v17, %v385_v31  ;;  %vm426_vm7 = vcmp.eq.s32.totalorder %v425_v56, %v1449_v43  ;;  %vm427_vm8 = vcmp.eq.s32.totalorder %v425_v56, %v1453_v46  ;;  %vm428_vm9 = vcmp.eq.s32.totalorder %v425_v56, %v1457_v47 }
  0xe6   :  { %1202 = vset.pattern.permute.xlu1 %v1309_v34  ;;  %v405_v34 = vsel %vm402_vm1, 1.0, %v1314_v49  ;;  %v429_v55 = vsel %vm426_vm7, 1.0, %v1314_v49  ;;  %v430_v27 = vsel %vm427_vm8, 1.0, %v1314_v49  ;;  %v431_v1 = vsel %vm428_vm9, 1.0, %v1314_v49 }
  0xe7   :  { %811 = vperm.xlu1 %1202, %v1581_v38   ;;  %v408_v3 = vadd.f32 %v405_v34, %v396_v26  ;;  %v409_v32 = vadd.f32 %v406_v50, %v397_v61  ;;  %v434_v42 = vadd.f32 %v431_v1, %v422_v2  ;;  %vm463_vm1 = vcmp.eq.s32.totalorder %v1708_v5, %v1453_v46 }
  0xe8   :  { %1203 = vset.pattern.permute.xlu2 %v1300_v23  ;;  %v466_v30 = vsel %vm463_vm1, 1.0, %v1314_v49  ;;  %v479_v56 = vsel %vm476_vm5, 1.0, %v1314_v49  ;;  %vm500_vm9 = vcmp.eq.s32.totalorder %v1736_v57, %v1449_v43  ;;  %v504_v26 = vsel %vm501_vm10, 1.0, %v1314_v49 }
  0xe9   :  { %823 = vperm.xlu2 %1203, %v1581_v38   ;;  %v1763_v20 = vpop.permute.xlu2 %522  ;;  %v420_v0 = vadd.f32 %v417_v28, %v408_v3  ;;  %v446_v24 = vadd.f32 %v443_v6, %v434_v42  ;;  %v503_v29 = vsel %vm500_vm9, 1.0, %v1314_v49  ;;  %v505_v34 = vsel %vm502_vm11, 1.0, %v1314_v49 }
  0xea   :  { %vm525_vm0 = vcmp.eq.s32.totalorder %v1763_v20, %v1453_v46  ;;  %vm526_vm1 = vcmp.eq.s32.totalorder %v1763_v20, %v1457_v47 }
  0xeb   :  { %v432_v8 = vadd.f32 %v429_v55, %v420_v0  ;;  %v528_v55 = vsel %vm525_vm0, 1.0, %v1314_v49  ;;  %v529_v0 = vsel %vm526_vm1, 1.0, %v1314_v49 }
  0xed   :  { %v449_v23 = vpop.permute.xlu1 %448  ;;  %v444_v11 = vadd.f32 %v441_v4, %v432_v8  ;;  %v540_v8 = vsel %vm537_vm3, 1.0, %v1314_v49  ;;  %v541_v4 = vsel %vm538_vm4, 1.0, %v1314_v49 }
  0xee   :  { %vm450_vm13 = vcmp.eq.s32.totalorder %v449_v23, %v1449_v43  ;;  %vm451_vm14 = vcmp.eq.s32.totalorder %v449_v23, %v1453_v46  ;;  %vm452_vm15 = vcmp.eq.s32.totalorder %v449_v23, %v1457_v47 }
  0xef   :  { %1205 = vset.pattern.permute.xlu1 %v1311_v37  ;;  %v421_v37 = vadd.f32 %v418_v9, %v409_v32  ;;  %v453_v60 = vsel %vm450_vm13, 1.0, %v1314_v49  ;;  %v454_v14 = vsel %vm451_vm14, 1.0, %v1314_v49  ;;  %v455_v18 = vsel %vm452_vm15, 1.0, %v1314_v49 }
  0xf0   :  { %847 = vperm.xlu1 %1205, %v1581_v38   ;;  %v456_v35 = vadd.f32 %v453_v60, %v444_v11  ;;  %v458_v48 = vadd.f32 %v455_v18, %v446_v24  ;;  %vm524_vm15 = vcmp.eq.s32.totalorder %v1763_v20, %v1449_v43  ;;  %v539_v20 = vsel %vm536_vm2, 1.0, %v1314_v49 }
  0xf1   :  { %1206 = vset.pattern.permute.xlu2 %v1312_v39  ;;  %v433_v39 = vadd.f32 %v430_v27, %v421_v37  ;;  %v527_v52 = vsel %vm524_vm15, 1.0, %v1314_v49 }
  0xf2   :  { %859 = vperm.xlu2 %1206, %v1581_v38   ;;  %v1795_v63 = vpop.permute.xlu2 %558  ;;  %v468_v44 = vadd.f32 %v465_v16, %v456_v35  ;;  %v470_v45 = vadd.f32 %v467_v41, %v458_v48  ;;  %v595_v41 = vpop.permute.xlu0 %594 }
  0xf3   :  { %v445_v13 = vadd.f32 %v442_v19, %v433_v39  ;;  %vm561_vm9 = vcmp.eq.s32.totalorder %v1795_v63, %v1453_v46  ;;  %vm562_vm10 = vcmp.eq.s32.totalorder %v1795_v63, %v1457_v47  ;;  %vm596_vm1 = vcmp.eq.s32.totalorder %v595_v41, %v1449_v43 }
  0xf4   :  { %v480_v10 = vadd.f32 %v477_v33, %v468_v44  ;;  %v482_v17 = vadd.f32 %v479_v56, %v470_v45  ;;  %v564_v24 = vsel %vm561_vm9, 1.0, %v1314_v49  ;;  %v565_v35 = vsel %vm562_vm10, 1.0, %v1314_v49 }
  0xf5   :  { %v457_v40 = vadd.f32 %v454_v14, %v445_v13  ;;  %vm597_vm2 = vcmp.eq.s32.totalorder %v595_v41, %v1453_v46  ;;  %vm598_vm3 = vcmp.eq.s32.totalorder %v595_v41, %v1457_v47 }
  0xf6   :  { %v487_v38 = vpop.permute.xlu1 %486 }
  0xf7   :  { %vm488_vm6 = vcmp.eq.s32.totalorder %v487_v38, %v1449_v43  ;;  %v469_v5 = vadd.f32 %v466_v30, %v457_v40  ;;  %vm489_vm7 = vcmp.eq.s32.totalorder %v487_v38, %v1453_v46  ;;  %vm490_vm8 = vcmp.eq.s32.totalorder %v487_v38, %v1457_v47 }
  0xf8   :  { %v491_v59 = vsel %vm488_vm6, 1.0, %v1314_v49  ;;  %v492_v15 = vsel %vm489_vm7, 1.0, %v1314_v49  ;;  %v493_v7 = vsel %vm490_vm8, 1.0, %v1314_v49  ;;  %vm560_vm8 = vcmp.eq.s32.totalorder %v1795_v63, %v1449_v43 }
  0xf9   :  { %v481_v25 = vadd.f32 %v478_v54, %v469_v5  ;;  %v494_v12 = vadd.f32 %v491_v59, %v480_v10  ;;  %v496_v36 = vadd.f32 %v493_v7, %v482_v17  ;;  %v563_v18 = vsel %vm560_vm8, 1.0, %v1314_v49 }
  0xfa   :  { %v599_v7 = vsel %vm596_vm1, 1.0, %v1314_v49  ;;  %v600_v17 = vsel %vm597_vm2, 1.0, %v1314_v49 }
  0xfb   :  { %v1820_v58 = vpop.permute.xlu2 %582  ;;  %v495_v31 = vadd.f32 %v492_v15, %v481_v25  ;;  %v506_v61 = vadd.f32 %v503_v29, %v494_v12  ;;  %v508_v28 = vadd.f32 %v505_v34, %v496_v36  ;;  %v601_v12 = vsel %vm598_vm3, 1.0, %v1314_v49 }
  0xfc   :  { %vm585_vm15 = vcmp.eq.s32.totalorder %v1820_v58, %v1453_v46  ;;  %vm586_vm0 = vcmp.eq.s32.totalorder %v1820_v58, %v1457_v47 }
  0xfd   :  { %v507_v23 = vadd.f32 %v504_v26, %v495_v31  ;;  %v588_v59 = vsel %vm585_vm15, 1.0, %v1314_v49  ;;  %v589_v10 = vsel %vm586_vm0, 1.0, %v1314_v49 }
  0xff   :  { %v511_v53 = vpop.permute.xlu1 %510 }
 0x100   :  { %vm512_vm12 = vcmp.eq.s32.totalorder %v511_v53, %v1449_v43  ;;  %vm513_vm13 = vcmp.eq.s32.totalorder %v511_v53, %v1453_v46  ;;  %vm514_vm14 = vcmp.eq.s32.totalorder %v511_v53, %v1457_v47 }
 0x101   :  { %v515_v57 = vsel %vm512_vm12, 1.0, %v1314_v49  ;;  %v516_v62 = vsel %vm513_vm13, 1.0, %v1314_v49  ;;  %v517_v50 = vsel %vm514_vm14, 1.0, %v1314_v49  ;;  %vm584_vm14 = vcmp.eq.s32.totalorder %v1820_v58, %v1449_v43 }
 0x102   :  { %v518_v32 = vadd.f32 %v515_v57, %v506_v61  ;;  %v519_v9 = vadd.f32 %v516_v62, %v507_v23  ;;  %v520_v21 = vadd.f32 %v517_v50, %v508_v28  ;;  %v587_v45 = vsel %vm584_vm14, 1.0, %v1314_v49 }
 0x104   :  { %v1841_v27 = vpop.permute.xlu2 %618  ;;  %v530_v1 = vadd.f32 %v527_v52, %v518_v32  ;;  %v531_v37 = vadd.f32 %v528_v55, %v519_v9  ;;  %v532_v2 = vadd.f32 %v529_v0, %v520_v21  ;;  %v655_v0 = vpop.permute.xlu0 %654 }
 0x105   :  { %vm621_vm8 = vcmp.eq.s32.totalorder %v1841_v27, %v1453_v46  ;;  %vm622_vm9 = vcmp.eq.s32.totalorder %v1841_v27, %v1457_v47  ;;  %vm656_vm0 = vcmp.eq.s32.totalorder %v655_v0, %v1449_v43  ;;  %vm657_vm1 = vcmp.eq.s32.totalorder %v655_v0, %v1453_v46 }
 0x106   :  { %v542_v42 = vadd.f32 %v539_v20, %v530_v1  ;;  %v543_v38 = vadd.f32 %v540_v8, %v531_v37  ;;  %v544_v11 = vadd.f32 %v541_v4, %v532_v2  ;;  %v624_v28 = vsel %vm621_vm8, 1.0, %v1314_v49 }
 0x107   :  { %v625_v32 = vsel %vm622_vm9, 1.0, %v1314_v49  ;;  %vm658_vm2 = vcmp.eq.s32.totalorder %v655_v0, %v1457_v47 }
 0x108   :  { %v547_v3 = vpop.permute.xlu1 %546 }
 0x109   :  { %vm548_vm5 = vcmp.eq.s32.totalorder %v547_v3, %v1449_v43  ;;  %vm549_vm6 = vcmp.eq.s32.totalorder %v547_v3, %v1453_v46  ;;  %vm550_vm7 = vcmp.eq.s32.totalorder %v547_v3, %v1457_v47 }
 0x10a   :  { %v551_v39 = vsel %vm548_vm5, 1.0, %v1314_v49  ;;  %v552_v6 = vsel %vm549_vm6, 1.0, %v1314_v49  ;;  %v553_v60 = vsel %vm550_vm7, 1.0, %v1314_v49  ;;  %vm620_vm7 = vcmp.eq.s32.totalorder %v1841_v27, %v1449_v43 }
 0x10b   :  { %v554_v14 = vadd.f32 %v551_v39, %v542_v42  ;;  %v555_v22 = vadd.f32 %v552_v6, %v543_v38  ;;  %v556_v13 = vadd.f32 %v553_v60, %v544_v11  ;;  %v623_v51 = vsel %vm620_vm7, 1.0, %v1314_v49  ;;  %v885_v39 = vld [vmem:[#allocation4 + $0x78] sm:$0xff]  ;;  %v884_v11 = vld [vmem:[#allocation4 + $0x70] sm:$0xff] }
 0x10c   :  { %v901_v42 = vld [vmem:[#allocation4 + $0xf8] sm:$0xff]  ;;  %911 = vmatpush.msra.mxu0 %v885_v39 }
 0x10d   :  { %v1867_v63 = vpop.permute.xlu2 %642  ;;  %v566_v40 = vadd.f32 %v563_v18, %v554_v14  ;;  %v567_v44 = vadd.f32 %v564_v24, %v555_v22  ;;  %v568_v33 = vadd.f32 %v565_v35, %v556_v13  ;;  %931 = vmatpush.msra.mxu1 %v901_v42  ;;  %v900_v14 = vld [vmem:[#allocation4 + $0xf0] sm:$0xff]  ;;  %v659_v18 = vsel %vm656_vm0, 1.0, %v1314_v49  ;;  %v883_v22 = vld [vmem:[#allocation4 + $0x68] sm:$0xff] }
 0x10e   :  { %vm645_vm14 = vcmp.eq.s32.totalorder %v1867_v63, %v1453_v46  ;;  %vm646_vm15 = vcmp.eq.s32.totalorder %v1867_v63, %v1457_v47  ;;  %912 = vmatpush.msra.mxu0 %v884_v11  ;;  %v899_v13 = vld [vmem:[#allocation4 + $0xe8] sm:$0xff]  ;;  %v874_v11 = vld [vmem:[#allocation4 + $0x20] sm:$0xff] }
 0x10f   :  { %v649_v6 = vsel %vm646_vm15, 1.0, %v1314_v49  ;;  %932 = vmatpush.msra.mxu1 %v900_v14  ;;  %v875_v42 = vld [vmem:[#allocation4 + $0x28] sm:$0xff]  ;;  %v890_v14 = vld [vmem:[#allocation4 + $0xa0] sm:$0xff] }
 0x110   :  { %913 = vmatpush.msra.mxu0 %v883_v22 }
 0x111   :  { %v571_v19 = vpop.permute.xlu1 %570  ;;  %933 = vmatpush.msra.mxu1 %v899_v13  ;;  %v873_v13 = vld [vmem:[#allocation4 + $0x18] sm:$0xff] }
 0x112   :  { %vm572_vm11 = vcmp.eq.s32.totalorder %v571_v19, %v1449_v43  ;;  %vm573_vm12 = vcmp.eq.s32.totalorder %v571_v19, %v1453_v46  ;;  %vm574_vm13 = vcmp.eq.s32.totalorder %v571_v19, %v1457_v47  ;;  %v648_v19 = vsel %vm645_vm14, 1.0, %v1314_v49 }
 0x113   :  { %v575_v16 = vsel %vm572_vm11, 1.0, %v1314_v49  ;;  %v576_v48 = vsel %vm573_vm12, 1.0, %v1314_v49  ;;  %v577_v30 = vsel %vm574_vm13, 1.0, %v1314_v49  ;;  %vm644_vm13 = vcmp.eq.s32.totalorder %v1867_v63, %v1449_v43  ;;  %v898_v63 = vld [vmem:[#allocation4 + $0xe0] sm:$0xff] }
 0x114   :  { %v578_v5 = vadd.f32 %v575_v16, %v566_v40  ;;  %v579_v54 = vadd.f32 %v576_v48, %v567_v44  ;;  %v580_v56 = vadd.f32 %v577_v30, %v568_v33  ;;  %v647_v37 = vsel %vm644_vm13, 1.0, %v1314_v49  ;;  %v882_v16 = vld [vmem:[#allocation4 + $0x60] sm:$0xff]  ;;  %934 = vmatpush.msra.mxu1 %v898_v63 }
 0x115   :  { %v660_v40 = vsel %vm657_vm1, 1.0, %v1314_v49  ;;  %v661_v48 = vsel %vm658_vm2, 1.0, %v1314_v49  ;;  %914 = vmatpush.msra.mxu0 %v882_v16 }
 0x116   :  { %v590_v15 = vadd.f32 %v587_v45, %v578_v5  ;;  %v591_v58 = vadd.f32 %v588_v59, %v579_v54  ;;  %v592_v25 = vadd.f32 %v589_v10, %v580_v56  ;;  %v1890_v31 = vpop.permute.xlu2 %679  ;;  %v881_v54 = vld [vmem:[#allocation4 + $0x58] sm:$0xff] }
 0x117   :  { %vm682_vm7 = vcmp.eq.s32.totalorder %v1890_v31, %v1453_v46  ;;  %v897_v56 = vld [vmem:[#allocation4 + $0xd8] sm:$0xff]  ;;  %vm683_vm8 = vcmp.eq.s32.totalorder %v1890_v31, %v1457_v47  ;;  %915 = vmatpush.msra.mxu0 %v881_v54  ;;  %v887_v54 = vld [vmem:[#allocation4 + $0x88] sm:$0xff] }
 0x118   :  { %v602_v36 = vadd.f32 %v599_v7, %v590_v15  ;;  %v603_v57 = vadd.f32 %v600_v17, %v591_v58  ;;  %v604_v61 = vadd.f32 %v601_v12, %v592_v25  ;;  %935 = vmatpush.msra.mxu1 %v897_v56  ;;  %v880_v25 = vld [vmem:[#allocation4 + $0x50] sm:$0xff]  ;;  %v879_v12 = vld [vmem:[#allocation4 + $0x48] sm:$0xff] }
 0x119   :  { %v896_v17 = vld [vmem:[#allocation4 + $0xd0] sm:$0xff]  ;;  %916 = vmatpush.msra.mxu0 %v880_v25 }
 0x11a   :  { %v607_v53 = vpop.permute.xlu1 %606  ;;  %936 = vmatpush.msra.mxu1 %v896_v17 }
 0x11b   :  { %vm608_vm4 = vcmp.eq.s32.totalorder %v607_v53, %v1449_v43  ;;  %vm609_vm5 = vcmp.eq.s32.totalorder %v607_v53, %v1453_v46  ;;  %vm610_vm6 = vcmp.eq.s32.totalorder %v607_v53, %v1457_v47  ;;  %917 = vmatpush.msra.mxu0 %v879_v12 }
 0x11c   :  { %v611_v29 = vsel %vm608_vm4, 1.0, %v1314_v49  ;;  %v612_v26 = vsel %vm609_vm5, 1.0, %v1314_v49  ;;  %v613_v34 = vsel %vm610_vm6, 1.0, %v1314_v49  ;;  %vm681_vm6 = vcmp.eq.s32.totalorder %v1890_v31, %v1449_v43 }
 0x11d   :  { %v614_v62 = vadd.f32 %v611_v29, %v602_v36  ;;  %v615_v3 = vadd.f32 %v612_v26, %v603_v57  ;;  %v616_v23 = vadd.f32 %v613_v34, %v604_v61  ;;  %v684_v59 = vsel %vm681_vm6, 1.0, %v1314_v49  ;;  %v895_v36 = vld [vmem:[#allocation4 + $0xc8] sm:$0xff]  ;;  %v878_v61 = vld [vmem:[#allocation4 + $0x40] sm:$0xff] }
 0x11e   :  { %v685_v29 = vsel %vm682_vm7, 1.0, %v1314_v49  ;;  %v686_v26 = vsel %vm683_vm8, 1.0, %v1314_v49  ;;  %937 = vmatpush.msra.mxu1 %v895_v36  ;;  %918 = vmatpush.msra.mxu0 %v878_v61  ;;  %v986_v61 = vld [vmem:[#allocation6 + $0x70] sm:$0xff] }
 0x11f   :  { %v626_v9 = vadd.f32 %v623_v51, %v614_v62  ;;  %v627_v27 = vadd.f32 %v624_v28, %v615_v3  ;;  %v628_v1 = vadd.f32 %v625_v32, %v616_v23  ;;  %v1916_v2 = vpop.permute.xlu2 %703  ;;  %v894_v62 = vld [vmem:[#allocation4 + $0xc0] sm:$0xff]  ;;  %v716_v51 = vpop.permute.xlu0 %715 }
 0x120   :  { %vm706_vm13 = vcmp.eq.s32.totalorder %v1916_v2, %v1453_v46  ;;  %vm707_vm14 = vcmp.eq.s32.totalorder %v1916_v2, %v1457_v47  ;;  %938 = vmatpush.msra.mxu1 %v894_v62  ;;  %vm717_vm15 = vcmp.eq.s32.totalorder %v716_v51, %v1449_v43  ;;  %vm718_vm0 = vcmp.eq.s32.totalorder %v716_v51, %v1453_v46 }
 0x121   :  { %v709_v0 = vsel %vm706_vm13, 1.0, %v1314_v49  ;;  %vm719_vm1 = vcmp.eq.s32.totalorder %v716_v51, %v1457_v47 }
 0x123   :  { %v631_v50 = vpop.permute.xlu1 %630 }
 0x124   :  { %vm632_vm10 = vcmp.eq.s32.totalorder %v631_v50, %v1449_v43  ;;  %vm633_vm11 = vcmp.eq.s32.totalorder %v631_v50, %v1453_v46  ;;  %vm634_vm12 = vcmp.eq.s32.totalorder %v631_v50, %v1457_v47 }
 0x125   :  { %v635_v52 = vsel %vm632_vm10, 1.0, %v1314_v49  ;;  %v636_v21 = vsel %vm633_vm11, 1.0, %v1314_v49  ;;  %v637_v55 = vsel %vm634_vm12, 1.0, %v1314_v49  ;;  %vm705_vm12 = vcmp.eq.s32.totalorder %v1916_v2, %v1449_v43 }
 0x126   :  { %v638_v20 = vadd.f32 %v635_v52, %v626_v9  ;;  %v639_v8 = vadd.f32 %v636_v21, %v627_v27  ;;  %v640_v4 = vadd.f32 %v637_v55, %v628_v1  ;;  %v708_v32 = vsel %vm705_vm12, 1.0, %v1314_v49  ;;  %v877_v9 = vld [vmem:[#allocation4 + $0x38] sm:$0xff] }
 0x127   :  { %v893_v21 = vld [vmem:[#allocation4 + $0xb8] sm:$0xff]  ;;  %919 = vmatpush.msra.mxu0 %v877_v9  ;;  %v710_v27 = vsel %vm707_vm14, 1.0, %v1314_v49  ;;  %v720_v2 = vsel %vm717_vm15, 1.0, %v1314_v49 }
 0x128   :  { %v650_v38 = vadd.f32 %v647_v37, %v638_v20  ;;  %v651_v24 = vadd.f32 %v648_v19, %v639_v8  ;;  %v652_v35 = vadd.f32 %v649_v6, %v640_v4  ;;  %v1945_v10 = vpop.permute.xlu2 %739  ;;  %939 = vmatpush.msra.mxu1 %v893_v21  ;;  %v876_v20 = vld [vmem:[#allocation4 + $0x30] sm:$0xff]  ;;  %v891_v19 = vld [vmem:[#allocation4 + $0xa8] sm:$0xff] }
 0x129   :  { %v892_v37 = vld [vmem:[#allocation4 + $0xb0] sm:$0xff]  ;;  %920 = vmatpush.msra.mxu0 %v876_v20  ;;  %vm742_vm6 = vcmp.eq.s32.totalorder %v1945_v10, %v1453_v46  ;;  %vm743_vm7 = vcmp.eq.s32.totalorder %v1945_v10, %v1457_v47 }
 0x12a   :  { %v662_v41 = vadd.f32 %v659_v18, %v650_v38  ;;  %v663_v5 = vadd.f32 %v660_v40, %v651_v24  ;;  %v664_v45 = vadd.f32 %v661_v48, %v652_v35  ;;  %940 = vmatpush.msra.mxu1 %v892_v37  ;;  %v722_v18 = vsel %vm719_vm1, 1.0, %v1314_v49  ;;  %v889_v24 = vld [vmem:[#allocation4 + $0x98] sm:$0xff] }
 0x12b   :  { %921 = vmatpush.msra.mxu0 %v875_v42  ;;  %v746_v56 = vsel %vm743_vm7, 1.0, %v1314_v49 }
 0x12c   :  { %v667_v60 = vpop.permute.xlu1 %666  ;;  %941 = vmatpush.msra.mxu1 %v891_v19 }
 0x12d   :  { %vm668_vm3 = vcmp.eq.s32.totalorder %v667_v60, %v1449_v43  ;;  %vm669_vm4 = vcmp.eq.s32.totalorder %v667_v60, %v1453_v46  ;;  %vm670_vm5 = vcmp.eq.s32.totalorder %v667_v60, %v1457_v47  ;;  %v721_v60 = vsel %vm718_vm0, 1.0, %v1314_v49  ;;  %922 = vmatpush.msra.mxu0 %v874_v11 }
 0x12e   :  { %v671_v30 = vsel %vm668_vm3, 1.0, %v1314_v49  ;;  %v672_v44 = vsel %vm669_vm4, 1.0, %v1314_v49  ;;  %v673_v33 = vsel %vm670_vm5, 1.0, %v1314_v49  ;;  %vm741_vm5 = vcmp.eq.s32.totalorder %v1945_v10, %v1449_v43  ;;  %942 = vmatpush.msra.mxu1 %v890_v14  ;;  %v870_v10 = vld [vmem:[#allocation4] sm:$0xff] }
 0x12f   :  { %v674_v53 = vadd.f32 %v671_v30, %v662_v41  ;;  %v675_v15 = vadd.f32 %v672_v44, %v663_v5  ;;  %v676_v7 = vadd.f32 %v673_v33, %v664_v45  ;;  %v744_v30 = vsel %vm741_vm5, 1.0, %v1314_v49  ;;  %923 = vmatpush.msra.mxu0 %v873_v13  ;;  %v872_v44 = vld [vmem:[#allocation4 + $0x10] sm:$0xff]  ;;  %v871_v5 = vld [vmem:[#allocation4 + $0x8] sm:$0xff] }
 0x130   :  { %943 = vmatpush.msra.mxu1 %v889_v24  ;;  %v888_v33 = vld [vmem:[#allocation4 + $0x90] sm:$0xff]  ;;  %v980_v24 = vld [vmem:[#allocation6 + $0x40] sm:$0xff] }
 0x131   :  { %v687_v34 = vadd.f32 %v684_v59, %v674_v53  ;;  %v688_v3 = vadd.f32 %v685_v29, %v675_v15  ;;  %v689_v31 = vadd.f32 %v686_v26, %v676_v7  ;;  %v1971_v4 = vpop.permute.xlu2 %763  ;;  %v745_v53 = vsel %vm742_vm6, 1.0, %v1314_v49  ;;  %924 = vmatpush.msra.mxu0 %v872_v44  ;;  %v886_v7 = vld [vmem:[#allocation4 + $0x80] sm:$0xff] }
 0x132   :  { %944 = vmatpush.msra.mxu1 %v888_v33  ;;  %vm765_vm8 = vcmp.eq.s32.totalorder %v1971_v4, %v1449_v43  ;;  %vm767_vm13 = vcmp.eq.s32.totalorder %v1971_v4, %v1457_v47 }
 0x133   :  { %925 = vmatpush.msra.mxu0 %v871_v5 }
 0x134   :  { %945 = vmatpush.msra.mxu1 %v887_v54 }
 0x135   :  { %v692_v58 = vpop.permute.xlu1 %691  ;;  %926 = vmatpush.msra.mxu0 %v870_v10 }
 0x136   :  { %vm693_vm9 = vcmp.eq.s32.totalorder %v692_v58, %v1449_v43  ;;  %vm694_vm10 = vcmp.eq.s32.totalorder %v692_v58, %v1453_v46  ;;  %vm695_vm11 = vcmp.eq.s32.totalorder %v692_v58, %v1457_v47  ;;  %v902_v58 = vld [vmem:[#allocation4 + $0x100] sm:$0xff]  ;;  %946 = vmatpush.msra.mxu1 %v886_v7 }
 0x137   :  { %v696_v57 = vsel %vm693_vm9, 1.0, %v1314_v49  ;;  %v697_v50 = vsel %vm694_vm10, 1.0, %v1314_v49  ;;  %v698_v23 = vsel %vm695_vm11, 1.0, %v1314_v49  ;;  %vm766_vm9 = vcmp.eq.s32.totalorder %v1971_v4, %v1453_v46  ;;  %966 = vmatpush.msra.mxu2 %v902_v58  ;;  %v982_v4 = vld [vmem:[#allocation6 + $0x50] sm:$0xff] }
 0x138   :  { %v699_v28 = vadd.f32 %v696_v57, %v687_v34  ;;  %v700_v52 = vadd.f32 %v697_v50, %v688_v3  ;;  %v701_v55 = vadd.f32 %v698_v23, %v689_v31  ;;  %v776_v34 = vpop.permute.xlu0 %775  ;;  %v987_v57 = vld [vmem:[#allocation6 + $0x78] sm:$0xff]  ;;  %v768_v3 = vsel %vm765_vm8, 1.0, %v1314_v49 }
 0x139   :  { %992 = vmatpush.msra.mxu3 %v987_v57  ;;  %v769_v23 = vsel %vm766_vm9, 1.0, %v1314_v49  ;;  %v770_v31 = vsel %vm767_vm13, 1.0, %v1314_v49  ;;  %vm777_vm14 = vcmp.eq.s32.totalorder %v776_v34, %v1449_v43  ;;  %vm778_vm15 = vcmp.eq.s32.totalorder %v776_v34, %v1453_v46 }
 0x13a   :  { %v711_v1 = vadd.f32 %v708_v32, %v699_v28  ;;  %v712_v39 = vadd.f32 %v709_v0, %v700_v52  ;;  %v713_v6 = vadd.f32 %v710_v27, %v701_v55  ;;  %v2001_v25 = vpop.permute.xlu2 %799  ;;  %v985_v28 = vld [vmem:[#allocation6 + $0x68] sm:$0xff]  ;;  %vm779_vm0 = vcmp.eq.s32.totalorder %v776_v34, %v1457_v47  ;;  %v984_v32 = vld [vmem:[#allocation6 + $0x60] sm:$0xff] }
 0x13b   :  { %993 = vmatpush.msra.mxu3 %v986_v61  ;;  %v780_v55 = vsel %vm777_vm14, 1.0, %v1314_v49  ;;  %v781_v0 = vsel %vm778_vm15, 1.0, %v1314_v49  ;;  %v782_v20 = vsel %vm779_vm0, 1.0, %v1314_v49  ;;  %vm802_vm5 = vcmp.eq.s32.totalorder %v2001_v25, %v1453_v46 }
 0x13c   :  { %v723_v22 = vadd.f32 %v720_v2, %v711_v1  ;;  %v724_v16 = vadd.f32 %v721_v60, %v712_v39  ;;  %v725_v48 = vadd.f32 %v722_v18, %v713_v6  ;;  %v983_v1 = vld [vmem:[#allocation6 + $0x58] sm:$0xff]  ;;  %vm803_vm6 = vcmp.eq.s32.totalorder %v2001_v25, %v1457_v47  ;;  %v981_v60 = vld [vmem:[#allocation6 + $0x48] sm:$0xff] }
 0x13d   :  { %994 = vmatpush.msra.mxu3 %v985_v28  ;;  %v805_v13 = vsel %vm802_vm5, 1.0, %v1314_v49 }
 0x13e   :  { %v728_v8 = vpop.permute.xlu1 %727 }
 0x13f   :  { %vm729_vm2 = vcmp.eq.s32.totalorder %v728_v8, %v1449_v43  ;;  %vm730_vm3 = vcmp.eq.s32.totalorder %v728_v8, %v1453_v46  ;;  %vm731_vm4 = vcmp.eq.s32.totalorder %v728_v8, %v1457_v47  ;;  %995 = vmatpush.msra.mxu3 %v984_v32 }
 0x140   :  { %v732_v38 = vsel %vm729_vm2, 1.0, %v1314_v49  ;;  %v733_v35 = vsel %vm730_vm3, 1.0, %v1314_v49  ;;  %v734_v63 = vsel %vm731_vm4, 1.0, %v1314_v49  ;;  %vm801_vm4 = vcmp.eq.s32.totalorder %v2001_v25, %v1449_v43  ;;  %v836_v14 = vpop.permute.xlu0 %835 }
 0x141   :  { %v735_v40 = vadd.f32 %v732_v38, %v723_v22  ;;  %v736_v41 = vadd.f32 %v733_v35, %v724_v16  ;;  %v737_v45 = vadd.f32 %v734_v63, %v725_v48  ;;  %996 = vmatpush.msra.mxu3 %v983_v1  ;;  %v804_v22 = vsel %vm801_vm4, 1.0, %v1314_v49 }
 0x142   :  { %v806_v35 = vsel %vm803_vm6, 1.0, %v1314_v49  ;;  %vm837_vm9 = vcmp.eq.s32.totalorder %v836_v14, %v1449_v43  ;;  %vm838_vm15 = vcmp.eq.s32.totalorder %v836_v14, %v1453_v46  ;;  %vm907_vm6 = vcmask 64512  }
 0x143   :  { %v747_v59 = vadd.f32 %v744_v30, %v735_v40  ;;  %v748_v17 = vadd.f32 %v745_v53, %v736_v41  ;;  %v749_v26 = vadd.f32 %v746_v56, %v737_v45  ;;  %v824_v8 = vpop.permute.xlu2 %823  ;;  %997 = vmatpush.msra.mxu3 %v982_v4  ;;  %v840_v7 = vsel %vm837_vm9, 1.0, %v1314_v49 }
 0x144   :  { %vm825_vm7 = vcmp.eq.s32.totalorder %v824_v8, %v1449_v43  ;;  %vm827_vm8 = vcmp.eq.s32.totalorder %v824_v8, %v1457_v47 }
 0x145   :  { %998 = vmatpush.msra.mxu3 %v981_v60  ;;  %v828_v48 = vsel %vm825_vm7, 1.0, %v1314_v49  ;;  %v830_v5 = vsel %vm827_vm8, 1.0, %v1314_v49  ;;  %vm1012_vm7 = vcmask 257024  }
 0x147   :  { %v752_v15 = vpop.permute.xlu1 %751  ;;  %999 = vmatpush.msra.mxu3 %v980_v24 }
 0x148   :  { %vm753_vm10 = vcmp.eq.s32.totalorder %v752_v15, %v1449_v43  ;;  %vm754_vm11 = vcmp.eq.s32.totalorder %v752_v15, %v1453_v46  ;;  %vm755_vm12 = vcmp.eq.s32.totalorder %v752_v15, %v1457_v47 }
 0x149   :  { %v756_v12 = vsel %vm753_vm10, 1.0, %v1314_v49  ;;  %v757_v29 = vsel %vm754_vm11, 1.0, %v1314_v49  ;;  %v758_v36 = vsel %vm755_vm12, 1.0, %v1314_v49  ;;  %vm839_vm10 = vcmp.eq.s32.totalorder %v836_v14, %v1457_v47 }
 0x14a   :  { %v759_v62 = vadd.f32 %v756_v12, %v747_v59  ;;  %v760_v50 = vadd.f32 %v757_v29, %v748_v17  ;;  %v761_v51 = vadd.f32 %v758_v36, %v749_v26  ;;  %vm826_vm11 = vcmp.eq.s32.totalorder %v824_v8, %v1453_v46 }
 0x14b   :  { %v829_v56 = vsel %vm826_vm11, 1.0, %v1314_v49  ;;  %v842_v25 = vsel %vm839_vm10, 1.0, %v1314_v49  ;;  %v841_v17 = vsel %vm838_vm15, 1.0, %v1314_v49 }
 0x14c   :  { %v771_v52 = vadd.f32 %v768_v3, %v759_v62  ;;  %v772_v9 = vadd.f32 %v769_v23, %v760_v50  ;;  %v773_v21 = vadd.f32 %v770_v31, %v761_v51  ;;  %v860_v59 = vpop.permute.xlu2 %859 }
 0x14d   :  { %vm863_vm0 = vcmp.eq.s32.totalorder %v860_v59, %v1457_v47 }
 0x14e   :  { %v783_v39 = vadd.f32 %v780_v55, %v771_v52  ;;  %v784_v42 = vadd.f32 %v781_v0, %v772_v9  ;;  %v785_v6 = vadd.f32 %v782_v20, %v773_v21  ;;  %v866_v36 = vsel %vm863_vm0, 1.0, %v1314_v49  ;;  %v976_v9 = vld [vmem:[#allocation6 + $0x20] sm:$0xff]  ;;  %v975_v21 = vld [vmem:[#allocation6 + $0x18] sm:$0xff]  ;;  %v973_v55 = vld [vmem:[#allocation6 + $0x8] sm:$0xff] }
 0x14f   :  { %v972_v0 = vld [vmem:[#allocation6] sm:$0xff] }
 0x150   :  { %v788_v27 = vpop.permute.xlu1 %787 }
 0x151   :  { %vm789_vm1 = vcmp.eq.s32.totalorder %v788_v27, %v1449_v43  ;;  %vm790_vm2 = vcmp.eq.s32.totalorder %v788_v27, %v1453_v46  ;;  %vm791_vm3 = vcmp.eq.s32.totalorder %v788_v27, %v1457_v47  ;;  %v1208_v27 = vld [vmem:[%s2101_s3] ss:$0 sm:$0xff] }
 0x152   :  { %v792_v37 = vsel %vm789_vm1, 1.0, %v1314_v49  ;;  %v793_v2 = vsel %vm790_vm2, 1.0, %v1314_v49  ;;  %v794_v19 = vsel %vm791_vm3, 1.0, %v1314_v49  ;;  %vm861_vm1 = vcmp.eq.s32.totalorder %v860_v59, %v1449_v43 }
 0x153   :  { %v795_v38 = vadd.f32 %v792_v37, %v783_v39  ;;  %v796_v11 = vadd.f32 %v793_v2, %v784_v42  ;;  %v797_v18 = vadd.f32 %v794_v19, %v785_v6  ;;  %vm862_vm2 = vcmp.eq.s32.totalorder %v860_v59, %v1453_v46  ;;  %v1209_v42 = vld [vmem:[%s2103_s5] ss:$0 sm:$0xff] }
 0x154   :  { %v864_v34 = vsel %vm861_vm1, 1.0, %v1314_v49  ;;  %v865_v51 = vsel %vm862_vm2, 1.0, %v1314_v49  ;;  %v1210_v59 = vld [vmem:[%s2104_s6] ss:$0 sm:$0xff]  ;;  %vm1091_vm1 = vcmask 1024  }
 0x155   :  { %v807_v16 = vadd.f32 %v804_v22, %v795_v38  ;;  %v808_v63 = vadd.f32 %v805_v13, %v796_v11  ;;  %v809_v30 = vadd.f32 %v806_v35, %v797_v18  ;;  %v1315_v38 = vmov 32.0  }
 0x159   :  { %v812_v40 = vpop.permute.xlu1 %811 }
 0x15a   :  { %vm813_vm12 = vcmp.eq.s32.totalorder %v812_v40, %v1449_v43  ;;  %vm814_vm13 = vcmp.eq.s32.totalorder %v812_v40, %v1453_v46  ;;  %vm815_vm14 = vcmp.eq.s32.totalorder %v812_v40, %v1457_v47 }
 0x15b   :  { %v816_v41 = vsel %vm813_vm12, 1.0, %v1314_v49  ;;  %v817_v44 = vsel %vm814_vm13, 1.0, %v1314_v49  ;;  %v818_v33 = vsel %vm815_vm14, 1.0, %v1314_v49  ;;  %vm1085_vm14 = vcmask 3072  }
 0x15c   :  { %v819_v45 = vadd.f32 %v816_v41, %v807_v16  ;;  %v820_v53 = vadd.f32 %v817_v44, %v808_v63  ;;  %v821_v54 = vadd.f32 %v818_v33, %v809_v30 }
 0x15e   :  { %v831_v15 = vadd.f32 %v828_v48, %v819_v45  ;;  %v833_v10 = vadd.f32 %v830_v5, %v821_v54  ;;  %v832_v58 = vadd.f32 %v829_v56, %v820_v53 }
 0x160   :  { %v845_v12 = vadd.f32 %v842_v25, %v833_v10  ;;  %v843_v26 = vadd.f32 %v840_v7, %v831_v15  ;;  %v844_v57 = vadd.f32 %v841_v17, %v832_v58  ;;  %v1211_v7 = vld [vmem:[%s2105_s7] ss:$0 sm:$0xff] }
 0x161   :  { %v1212_v17 = vld [vmem:[%s2106_s8] ss:$0 sm:$0xff] }
 0x162   :  { %v848_v29 = vpop.permute.xlu1 %847 }
 0x163   :  { %vm849_vm3 = vcmp.eq.s32.totalorder %v848_v29, %v1449_v43  ;;  %vm850_vm4 = vcmp.eq.s32.totalorder %v848_v29, %v1453_v46  ;;  %vm851_vm5 = vcmp.eq.s32.totalorder %v848_v29, %v1457_v47  ;;  %v979_v43 = vld [vmem:[#allocation6 + $0x38] sm:$0xff]  ;;  %v978_v46 = vld [vmem:[#allocation6 + $0x30] sm:$0xff]  ;;  %v977_v47 = vld [vmem:[#allocation6 + $0x28] sm:$0xff] }
 0x164   :  { %v854_v61 = vsel %vm851_vm5, 1.0, %v1314_v49  ;;  %v852_v62 = vsel %vm849_vm3, 1.0, %v1314_v49  ;;  %v853_v50 = vsel %vm850_vm4, 1.0, %v1314_v49  ;;  %1000 = vmatpush.msra.mxu3 %v979_v43  ;;  %v974_v49 = vld [vmem:[#allocation6 + $0x10] sm:$0xff] }
 0x165   :  { %v857_v3 = vadd.f32 %v854_v61, %v845_v12  ;;  %v855_v23 = vadd.f32 %v852_v62, %v843_v26  ;;  %v856_v28 = vadd.f32 %v853_v50, %v844_v57  ;;  %v1213_v26 = vld [vmem:[#allocation3] ss:$0 sm:$0xff] }
 0x166   :  { %1001 = vmatpush.msra.mxu3 %v978_v46 }
 0x167   :  { %v867_v31 = vadd.f32 %v864_v34, %v855_v23  ;;  %v868_v32 = vadd.f32 %v865_v51, %v856_v28  ;;  %v869_v52 = vadd.f32 %v866_v36, %v857_v3 }
 0x168   :  { %1002 = vmatpush.msra.mxu3 %v977_v47 }
 0x169   :  { %927 = vmatmul.f32.vlgmr.msra.gmra.mxu0 %v867_v31  ;;  %947 = vmatmul.f32.vlgmr.msra.gmra.mxu1 %v868_v32 }
 0x16a   :  { %1099 = vmatmul.msk.f32.vlgmr.msra.gmra.mxu2 %vm907_vm6, %v869_v52  ;;  %1003 = vmatpush.msra.mxu3 %v976_v9 }
 0x16c   :  { %1004 = vmatpush.msra.mxu3 %v975_v21 }
 0x16e   :  { %1005 = vmatpush.msra.mxu3 %v974_v49 }
 0x170   :  { %1006 = vmatpush.msra.mxu3 %v973_v55 }
 0x172   :  { %1007 = vmatpush.msra.mxu3 %v972_v0 }
 0x1e6   :  { %v928_v1 = vpop.f32.mrf.mxu0  ;;  %v948_v37 = vpop.f32.mrf.mxu1 }
 0x1e7   :  { %v929_v20 = vadd.f32 %v1208_v27, %v928_v1 }
 0x1e9   :  { %v949_v2 = vadd.f32 %v948_v37, %v929_v20 }
 0x1ed   :  { %v968_v8 = vpop.f32.mrf.mxu2 }
 0x1ee   :  { %v969_v4 = vadd.f32 %v968_v8, %v949_v2 }
 0x1f0   :  { %1214 = vtanh.f32 %v969_v4 }
 0x1f1   :  { %1216 = vrcp.f32 %v1315_v38 }
 0x1f6   :  { %v1215_v39 = vpop.eup %1214 }
 0x1f7   :  { %1008 = vmatmul.f32.vlgmr.msra.gmra.mxu3 %v1215_v39  ;;  %v1217_v11 = vpop.eup %1216 }
 0x1f8   :  { %v1017_v14 = vmul.f32 32.0, %v1217_v11  ;;  %vm1021_vm8 = vweird.f32 %v1217_v11 }
 0x1fa   :  { %v1018_v18 = vsub.f32 1.0, %v1017_v14 }
 0x1fc   :  { %v1019_v22 = vmul.f32 %v1217_v11, %v1018_v18 }
 0x1fe   :  { %v1020_v13 = vadd.f32 %v1217_v11, %v1019_v22 }
 0x200   :  { %v1022_v24 = vsel %vm1021_vm8, %v1217_v11, %v1020_v13 }
 0x27a   :  { %v1009_v19 = vpop.f32.mrf.mxu3 }
 0x27b   :  { %v1010_v6 = vadd.f32 %v1209_v42, %v1009_v19 }
 0x27d   :  { %v1013_v60 = vsel %vm1012_vm7, %v1010_v6, 0.0 }
 0x27e   :  { %1014 = vadd.xlane.f32.xlu1 %v1013_v60 }
 0x2f1   :  { %v1015_v35 = vpop.xlane.xlu1 %1014 }
 0x2f2   :  { %v1023_v16 = vmul.f32 %v1022_v24, %v1015_v35 }
 0x2f4   :  { %v1024_v63 = vsub.f32 %v1010_v6, %v1023_v16 }
 0x2f6   :  { %v1025_v40 = vmul.f32 %v1024_v63, %v1024_v63 }
 0x2f8   :  { %v1026_v48 = vsel %vm1012_vm7, %v1025_v40, 0.0 }
 0x2f9   :  { %1027 = vadd.xlane.f32.xlu2 %v1026_v48 }
 0x36c   :  { %v1028_v30 = vpop.xlane.xlu2 %1027 }
 0x36d   :  { %v1029_v41 = vmul.f32 %v1028_v30, %v1022_v24 }
 0x36f   :  { %v1030_v44 = vadd.f32 1e-05, %v1029_v41 }
 0x371   :  { %1218 = vrsqrt.f32 %v1030_v44  ;;  %vm1037_vm10 = vweird.f32 %v1030_v44 }
 0x377   :  { %v1219_v33 = vpop.eup %1218 }
 0x378   :  { %v1032_v5 = vmul.f32 %v1219_v33, %v1030_v44  ;;  %vm1038_vm9 = vweird.f32 %v1219_v33 }
 0x379   :  { %vm1039_vm11 = vmor %vm1037_vm10, %vm1038_vm9 }
 0x37a   :  { %v1033_v45 = vmul.f32 %v1219_v33, %v1032_v5 }
 0x37c   :  { %v1034_v53 = vmul.f32 0.5, %v1033_v45 }
 0x37e   :  { %v1035_v54 = vsub.f32 1.5, %v1034_v53 }
 0x380   :  { %v1036_v56 = vmul.f32 %v1219_v33, %v1035_v54 }
 0x382   :  { %v1040_v15 = vsel %vm1039_vm11, %v1219_v33, %v1036_v56 }
 0x383   :  { %v1041_v10 = vmul.f32 %v1040_v15, %v1024_v63 }
 0x385   :  { %v1046_v58 = vmul.f32 %v1210_v59, %v1041_v10 }
 0x387   :  { %v1051_v25 = vadd.f32 %v1211_v7, %v1046_v58 }
 0x389   :  { %v1052_v12 = vmax.f32 %v1051_v25, 0.0 }
 0x38b   :  { %v1057_v29 = vmul.f32 %v1212_v17, %v1052_v12 }
 0x38d   :  { %v1058_v36 = vsel %vm1012_vm7, %v1057_v29, 0.0 }
 0x38e   :  { %1059 = vadd.xlane.f32.xlu0 %v1058_v36 }
 0x401   :  { %v1060_v34 = vpop.xlane.xlu0 %1059 }
 0x402   :  { %v1065_v57 = vadd.f32 %v1213_v26, %v1060_v34 }
 0x404   :  { %v1100_v61 = vmul.f32 -1.442695, %v1065_v57 }
 0x406   :  { %1220 = vpow2.f32 %v1100_v61 }
 0x40c   :  { %v1221_v62 = vpop.eup %1220 }
 0x40d   :  { %v1069_v50 = vadd.f32 1.0, %v1221_v62 }
 0x40f   :  { %1222 = vrcp.f32 %v1069_v50  ;;  %v1081_v28 = vand.u32 2147483648, %v1069_v50  ;;  %v1079_v32 = vand.u32 2147483647, %v1069_v50  ;;  %vm1075_vm13 = vweird.f32 %v1069_v50 }
 0x411   :  { %v1082_v43 = vor.u32 1.1754944e-38, %v1081_v28  ;;  %vm1080_vm0 = vcmp.eq.f32.partialorder %v1079_v32, 8.507059e+37 }
 0x415   :  { %v1223_v51 = vpop.eup %1222 }
 0x416   :  { %v1071_v3 = vmul.f32 %v1223_v51, %v1069_v50  ;;  %vm1076_vm12 = vweird.f32 %v1223_v51 }
 0x417   :  { %vm1077_vm15 = vmor %vm1075_vm13, %vm1076_vm12 }
 0x418   :  { %v1072_v23 = vsub.f32 1.0, %v1071_v3 }
 0x41a   :  { %v1073_v31 = vmul.f32 %v1223_v51, %v1072_v23 }
 0x41c   :  { %v1074_v52 = vadd.f32 %v1223_v51, %v1073_v31 }
 0x41e   :  { %v1078_v46 = vsel %vm1077_vm15, %v1223_v51, %v1074_v52 }
 0x41f   :  { %v1083_v47 = vsel %vm1080_vm0, %v1082_v43, %v1078_v46 }
 0x420   :  { %1086 = vst.msk [vmem:[#allocation2] sm:$0xf] %vm1085_vm14, %v1083_v47 }
 0x427   :  { %v1087_v9 = vld [vmem:[#allocation2] sm:$0x3]  ;;  %v1088_v21 = vld [vmem:[#allocation2 + $0x2] sm:$0x3] }
 0x428   :  { %v1089_v49 = vadd.f32 %v1088_v21, %v1087_v9 }
 0x42a   :  { %v1090_v55 = vmul.f32 0.5, %v1089_v49 }
 0x42c   :  { %1092 = vst.msk [vmem:[%s2108_s10] sm:$0x3] %vm1091_vm1, %v1090_v55 }
 0x42d   :  { %1097 = vsyncpa [#allocation5], 1 }
 0x42e   :  { %1098 = vsyncpa [#allocation7], 1 }

</bundles_post_ra>
